<compile_context>
chip_gen: v6e
topology: v6e:2x2x1
jax: 0.10.0
libtpu: 0.0.40
codegen_flags: <defaults>
</compile_context>

<pallas_src>
import jax
import jax.numpy as jnp
from jax.experimental import pallas as pl
from jax.experimental.pallas import tpu as pltpu

LANES = 128

_LOSS_KEYS = ["col_l", "pho_l", "pho_l2", "cyc_l", "cyc_l2",
              "reg_temp_sm_l", "reg_min_l"]


def _kernel(gray_fine, gray_fw, gray_bw, gray_T, gray_bT, gray_tgt,
            xyzs_fine, xyzs_fw_bw, xyzs_bw_fw, xyzs_T, xyzs_bT,
            xyzs_fw, xyzs_bw,
            part_o):
    g = gray_tgt[...].astype(jnp.float32)
    xf = xyzs_fine[...].astype(jnp.float32)
    fw = xyzs_fw[...].astype(jnp.float32)
    bw = xyzs_bw[...].astype(jnp.float32)

    def sq_lanesum(ref):
        d = ref[...].astype(jnp.float32) - g
        return jnp.sum(d * d, axis=0, keepdims=True)           # (1, 128)

    def abs_lanesum(ref):
        d = ref[...].astype(jnp.float32) - xf
        return jnp.sum(jnp.abs(d), axis=0, keepdims=True)      # (1, 128)

    partials = (
        sq_lanesum(gray_fine),                                          # col_l
        sq_lanesum(gray_fw) + sq_lanesum(gray_bw),                      # pho_l
        sq_lanesum(gray_T) + sq_lanesum(gray_bT),                       # pho_l2
        abs_lanesum(xyzs_fw_bw) + abs_lanesum(xyzs_bw_fw),              # cyc_l
        abs_lanesum(xyzs_T) + abs_lanesum(xyzs_bT),                     # cyc_l2
        jnp.sum(jnp.abs(fw + bw - 2.0 * xf), axis=0, keepdims=True),    # reg_temp_sm_l
        jnp.sum(jnp.abs(fw - xf) + jnp.abs(bw - xf),
                axis=0, keepdims=True),                                 # reg_min_l
    )

    # Pack the 7 per-lane partial rows into one lane-dense (8, 128) tile:
    # sublane k holds partials[k]; sublane 7 is zero.
    sub = jax.lax.broadcasted_iota(jnp.int32, (8, LANES), 0)
    tile = jnp.zeros((8, LANES), jnp.float32)
    for k, v in enumerate(partials):
        tile = jnp.where(sub == k, v, tile)
    part_o[...] = tile


def _round_up(v, m):
    return ((v + m - 1) // m) * m


def _to_slab(x, rows_pad):
    """Flatten, zero-pad to rows_pad*LANES elements, reshape to (rows_pad, 128)."""
    flat = x.reshape(-1)
    pad = rows_pad * LANES - flat.shape[0]
    if pad:
        flat = jnp.pad(flat, (0, pad))
    return flat.reshape(rows_pad, LANES)


def neural_cmf_loss(inputs, targets, *, xyz_tile_rows=1024):
    """Pallas implementation of NeuralCMFLoss.forward.

    inputs:  dict of (N, C) arrays (gray_* have C=Cg, xyzs_* have C=Cx).
    targets: dict with 'gray' of shape (N, Cg).
    Returns a dict of 7 scalar losses (same keys as the PyTorch module).
    """
    gray_keys = ["gray_fine", "gray_fw", "gray_bw", "gray_T", "gray_bT"]
    xyz_keys = ["xyzs_fine", "xyzs_fw_bw", "xyzs_bw_fw", "xyzs_T", "xyzs_bT",
                "xyzs_fw", "xyzs_bw"]

    n, cg = targets["gray"].shape
    cx = inputs["xyzs_fine"].shape[1]
    eg = n * cg                      # un-padded element counts (for the means)
    ex = n * cx

    rg = pl.cdiv(eg, LANES)          # lane-dense rows per gray tensor
    rx = pl.cdiv(ex, LANES)          # lane-dense rows per xyz tensor

    # Tile the (larger) xyz group with ~xyz_tile_rows rows, then pick the gray
    # tile so both groups need the same number of grid steps.  Tile rows are
    # rounded up to the sublane quantum (8); slabs are zero-padded to fit.
    tx = min(_round_up(xyz_tile_rows, 8), _round_up(rx, 8))
    grid_n = pl.cdiv(rx, tx)
    tg = _round_up(pl.cdiv(rg, grid_n), 8)

    rg_pad = grid_n * tg
    rx_pad = grid_n * tx

    gray_slabs = ([_to_slab(inputs[k], rg_pad) for k in gray_keys]
                  + [_to_slab(targets["gray"], rg_pad)])
    xyz_slabs = [_to_slab(inputs[k], rx_pad) for k in xyz_keys]

    gray_spec = pl.BlockSpec((tg, LANES), lambda i: (i, 0))
    xyz_spec = pl.BlockSpec((tx, LANES), lambda i: (i, 0))
    out_spec = pl.BlockSpec((8, LANES), lambda i: (i, 0))

    # Explicit VMEM budget: 13 double-buffered input blocks + output buffers,
    # floored at 32 MiB, capped at 48 MiB (below v7x's 64 MiB physical VMEM).
    in_bytes = sum(2 * tg * LANES * s.dtype.itemsize for s in gray_slabs)
    in_bytes += sum(2 * tx * LANES * s.dtype.itemsize for s in xyz_slabs)
    in_bytes += 2 * 8 * LANES * 4
    vmem_limit = int(min(max(2 * in_bytes, 32 << 20), 48 << 20))

    total_bytes = sum(int(s.size) * s.dtype.itemsize
                      for s in gray_slabs + xyz_slabs) + grid_n * 8 * LANES * 4
    cost = pl.CostEstimate(
        flops=int(4 * (6 * rg_pad + 7 * rx_pad) * LANES),
        transcendentals=0,
        bytes_accessed=int(total_bytes))

    part = pl.pallas_call(
        _kernel,
        out_shape=jax.ShapeDtypeStruct((grid_n * 8, LANES), jnp.float32),
        grid_spec=pltpu.PrefetchScalarGridSpec(
            num_scalar_prefetch=0,
            grid=(grid_n,),
            in_specs=[gray_spec] * 6 + [xyz_spec] * 7,
            out_specs=out_spec,
        ),
        compiler_params=pltpu.CompilerParams(
            dimension_semantics=("parallel",),
            vmem_limit_bytes=vmem_limit),
        cost_estimate=cost,
    )(*gray_slabs, *xyz_slabs)

    # Tiny final reduction + scaling in plain JAX (keeps the kernel state-free
    # so the grid axis can be "parallel").
    sums = jnp.sum(part.reshape(grid_n, 8, LANES), axis=(0, 2))   # (8,)
    inv_g = 1.0 / float(eg)
    inv_x = 1.0 / float(ex)
    cyc_w = 0.1
    lambda_reg = 0.01
    return {
        "col_l": sums[0] * inv_g,
        "pho_l": sums[1] * inv_g,
        "pho_l2": sums[2] * inv_g,
        "cyc_l": cyc_w * sums[3] * inv_x,
        "cyc_l2": cyc_w * sums[4] * inv_x,
        "reg_temp_sm_l": lambda_reg * sums[5] * inv_x,
        "reg_min_l": lambda_reg * sums[6] * inv_x,
    }


def _reference(inputs, targets):
    g = targets["gray"].astype(jnp.float32)
    xf = inputs["xyzs_fine"].astype(jnp.float32)
    r = {}
    r["col_l"] = jnp.mean((inputs["gray_fine"] - g) ** 2, axis=1)
    pho = (inputs["gray_fw"] - g) ** 2 + (inputs["gray_bw"] - g) ** 2
    r["pho_l"] = jnp.mean(pho, axis=1)
    pho2 = (inputs["gray_T"] - g) ** 2 + (inputs["gray_bT"] - g) ** 2
    r["pho_l2"] = jnp.mean(pho2, axis=1)
    cyc = 0.1 * jnp.abs(inputs["xyzs_fw_bw"] - xf) + 0.1 * jnp.abs(inputs["xyzs_bw_fw"] - xf)
    r["cyc_l"] = jnp.mean(cyc, axis=1)
    cyc2 = 0.1 * jnp.abs(inputs["xyzs_T"] - xf) + 0.1 * jnp.abs(inputs["xyzs_bT"] - xf)
    r["cyc_l2"] = jnp.mean(cyc2, axis=1)
    fw, bw = inputs["xyzs_fw"], inputs["xyzs_bw"]
    r["reg_temp_sm_l"] = jnp.mean(0.01 * jnp.abs(fw + bw - 2.0 * xf), axis=1)
    r["reg_min_l"] = jnp.mean(0.01 * (jnp.abs(fw - xf) + jnp.abs(bw - xf)), axis=1)
    return {k: jnp.mean(v) for k, v in r.items()}


if __name__ == "__main__":
    # Small shapes: 6000 rays, gray C=1, xyz C=3.  N is deliberately NOT a
    # multiple of 128 and xyz_tile_rows is small so the multi-tile grid and the
    # zero-padding path are both exercised.
    N, CG, CX = 6000, 1, 3
    key = jax.random.PRNGKey(0)
    names = ["gray_fine", "gray_fw", "gray_bw", "gray_T", "gray_bT",
             "xyzs_fine", "xyzs_fw_bw", "xyzs_bw_fw", "xyzs_T", "xyzs_bT",
             "xyzs_fw", "xyzs_bw", "gray_tgt"]
    keys = jax.random.split(key, len(names))

    inputs = {}
    for nm, k in zip(names[:5], keys[:5]):
        inputs[nm] = jax.random.normal(k, (N, CG), dtype=jnp.float32)
    for nm, k in zip(names[5:12], keys[5:12]):
        inputs[nm] = jax.random.normal(k, (N, CX), dtype=jnp.float32)
    targets = {"gray": jax.random.normal(keys[12], (N, CG), dtype=jnp.float32)}

    out = neural_cmf_loss(inputs, targets, xyz_tile_rows=32)
    out = jax.block_until_ready(out)

    ref = _reference(inputs, targets)
    for k in _LOSS_KEYS:
        assert jnp.allclose(out[k], ref[k], rtol=1e-4, atol=1e-6), (
            f"mismatch for {k}: {out[k]} vs {ref[k]}")

    print("KERNEL_OK")
</pallas_src>

<mosaic_0001>
module attributes {stable_mosaic.version = 11 : i64} {
  func.func @_kernel(%arg0: i32, %arg1: memref<16x128xf32, #tpu.memory_space<vmem>>, %arg2: memref<16x128xf32, #tpu.memory_space<vmem>>, %arg3: memref<16x128xf32, #tpu.memory_space<vmem>>, %arg4: memref<16x128xf32, #tpu.memory_space<vmem>>, %arg5: memref<16x128xf32, #tpu.memory_space<vmem>>, %arg6: memref<16x128xf32, #tpu.memory_space<vmem>>, %arg7: memref<32x128xf32, #tpu.memory_space<vmem>>, %arg8: memref<32x128xf32, #tpu.memory_space<vmem>>, %arg9: memref<32x128xf32, #tpu.memory_space<vmem>>, %arg10: memref<32x128xf32, #tpu.memory_space<vmem>>, %arg11: memref<32x128xf32, #tpu.memory_space<vmem>>, %arg12: memref<32x128xf32, #tpu.memory_space<vmem>>, %arg13: memref<32x128xf32, #tpu.memory_space<vmem>>, %arg14: memref<8x128xf32, #tpu.memory_space<vmem>>) attributes {dimension_semantics = [#tpu.dimension_semantics<parallel>], iteration_bounds = array<i64: 5>, scalar_prefetch = 0 : i64, scratch_operands = 0 : i64, tpu.core_type = #tpu.core_type<tc>, window_params = [{transform_indices = @transform_0, window_bounds = array<i64: 16, 128>}, {transform_indices = @transform_1, window_bounds = array<i64: 16, 128>}, {transform_indices = @transform_2, window_bounds = array<i64: 16, 128>}, {transform_indices = @transform_3, window_bounds = array<i64: 16, 128>}, {transform_indices = @transform_4, window_bounds = array<i64: 16, 128>}, {transform_indices = @transform_5, window_bounds = array<i64: 16, 128>}, {transform_indices = @transform_6, window_bounds = array<i64: 32, 128>}, {transform_indices = @transform_7, window_bounds = array<i64: 32, 128>}, {transform_indices = @transform_8, window_bounds = array<i64: 32, 128>}, {transform_indices = @transform_9, window_bounds = array<i64: 32, 128>}, {transform_indices = @transform_10, window_bounds = array<i64: 32, 128>}, {transform_indices = @transform_11, window_bounds = array<i64: 32, 128>}, {transform_indices = @transform_12, window_bounds = array<i64: 32, 128>}, {transform_indices = @transform_13, window_bounds = array<i64: 8, 128>}]} {
    %c0 = arith.constant 0 : index
    %c0_0 = arith.constant 0 : index
    %0 = vector.load %arg6[%c0, %c0_0] : memref<16x128xf32, #tpu.memory_space<vmem>>, vector<16x128xf32>
    %c0_1 = arith.constant 0 : index
    %c0_2 = arith.constant 0 : index
    %1 = vector.load %arg7[%c0_1, %c0_2] : memref<32x128xf32, #tpu.memory_space<vmem>>, vector<32x128xf32>
    %c0_3 = arith.constant 0 : index
    %c0_4 = arith.constant 0 : index
    %2 = vector.load %arg12[%c0_3, %c0_4] : memref<32x128xf32, #tpu.memory_space<vmem>>, vector<32x128xf32>
    %c0_5 = arith.constant 0 : index
    %c0_6 = arith.constant 0 : index
    %3 = vector.load %arg13[%c0_5, %c0_6] : memref<32x128xf32, #tpu.memory_space<vmem>>, vector<32x128xf32>
    %c0_7 = arith.constant 0 : index
    %c0_8 = arith.constant 0 : index
    %4 = vector.load %arg1[%c0_7, %c0_8] : memref<16x128xf32, #tpu.memory_space<vmem>>, vector<16x128xf32>
    %5 = arith.subf %4, %0 : vector<16x128xf32>
    %6 = arith.mulf %5, %5 : vector<16x128xf32>
    %cst = arith.constant dense<0.000000e+00> : vector<128xf32>
    %7 = vector.multi_reduction <add>, %6, %cst [0] : vector<16x128xf32> to vector<128xf32>
    %8 = vector.shape_cast %7 : vector<128xf32> to vector<1x128xf32>
    %c0_9 = arith.constant 0 : index
    %c0_10 = arith.constant 0 : index
    %9 = vector.load %arg2[%c0_9, %c0_10] : memref<16x128xf32, #tpu.memory_space<vmem>>, vector<16x128xf32>
    %10 = arith.subf %9, %0 : vector<16x128xf32>
    %11 = arith.mulf %10, %10 : vector<16x128xf32>
    %cst_11 = arith.constant dense<0.000000e+00> : vector<128xf32>
    %12 = vector.multi_reduction <add>, %11, %cst_11 [0] : vector<16x128xf32> to vector<128xf32>
    %13 = vector.shape_cast %12 : vector<128xf32> to vector<1x128xf32>
    %c0_12 = arith.constant 0 : index
    %c0_13 = arith.constant 0 : index
    %14 = vector.load %arg3[%c0_12, %c0_13] : memref<16x128xf32, #tpu.memory_space<vmem>>, vector<16x128xf32>
    %15 = arith.subf %14, %0 : vector<16x128xf32>
    %16 = arith.mulf %15, %15 : vector<16x128xf32>
    %cst_14 = arith.constant dense<0.000000e+00> : vector<128xf32>
    %17 = vector.multi_reduction <add>, %16, %cst_14 [0] : vector<16x128xf32> to vector<128xf32>
    %18 = vector.shape_cast %17 : vector<128xf32> to vector<1x128xf32>
    %19 = arith.addf %13, %18 : vector<1x128xf32>
    %c0_15 = arith.constant 0 : index
    %c0_16 = arith.constant 0 : index
    %20 = vector.load %arg4[%c0_15, %c0_16] : memref<16x128xf32, #tpu.memory_space<vmem>>, vector<16x128xf32>
    %21 = arith.subf %20, %0 : vector<16x128xf32>
    %22 = arith.mulf %21, %21 : vector<16x128xf32>
    %cst_17 = arith.constant dense<0.000000e+00> : vector<128xf32>
    %23 = vector.multi_reduction <add>, %22, %cst_17 [0] : vector<16x128xf32> to vector<128xf32>
    %24 = vector.shape_cast %23 : vector<128xf32> to vector<1x128xf32>
    %c0_18 = arith.constant 0 : index
    %c0_19 = arith.constant 0 : index
    %25 = vector.load %arg5[%c0_18, %c0_19] : memref<16x128xf32, #tpu.memory_space<vmem>>, vector<16x128xf32>
    %26 = arith.subf %25, %0 : vector<16x128xf32>
    %27 = arith.mulf %26, %26 : vector<16x128xf32>
    %cst_20 = arith.constant dense<0.000000e+00> : vector<128xf32>
    %28 = vector.multi_reduction <add>, %27, %cst_20 [0] : vector<16x128xf32> to vector<128xf32>
    %29 = vector.shape_cast %28 : vector<128xf32> to vector<1x128xf32>
    %30 = arith.addf %24, %29 : vector<1x128xf32>
    %c0_21 = arith.constant 0 : index
    %c0_22 = arith.constant 0 : index
    %31 = vector.load %arg8[%c0_21, %c0_22] : memref<32x128xf32, #tpu.memory_space<vmem>>, vector<32x128xf32>
    %32 = arith.subf %31, %1 : vector<32x128xf32>
    %33 = math.absf %32 : vector<32x128xf32>
    %cst_23 = arith.constant dense<0.000000e+00> : vector<128xf32>
    %34 = vector.multi_reduction <add>, %33, %cst_23 [0] : vector<32x128xf32> to vector<128xf32>
    %35 = vector.shape_cast %34 : vector<128xf32> to vector<1x128xf32>
    %c0_24 = arith.constant 0 : index
    %c0_25 = arith.constant 0 : index
    %36 = vector.load %arg9[%c0_24, %c0_25] : memref<32x128xf32, #tpu.memory_space<vmem>>, vector<32x128xf32>
    %37 = arith.subf %36, %1 : vector<32x128xf32>
    %38 = math.absf %37 : vector<32x128xf32>
    %cst_26 = arith.constant dense<0.000000e+00> : vector<128xf32>
    %39 = vector.multi_reduction <add>, %38, %cst_26 [0] : vector<32x128xf32> to vector<128xf32>
    %40 = vector.shape_cast %39 : vector<128xf32> to vector<1x128xf32>
    %41 = arith.addf %35, %40 : vector<1x128xf32>
    %c0_27 = arith.constant 0 : index
    %c0_28 = arith.constant 0 : index
    %42 = vector.load %arg10[%c0_27, %c0_28] : memref<32x128xf32, #tpu.memory_space<vmem>>, vector<32x128xf32>
    %43 = arith.subf %42, %1 : vector<32x128xf32>
    %44 = math.absf %43 : vector<32x128xf32>
    %cst_29 = arith.constant dense<0.000000e+00> : vector<128xf32>
    %45 = vector.multi_reduction <add>, %44, %cst_29 [0] : vector<32x128xf32> to vector<128xf32>
    %46 = vector.shape_cast %45 : vector<128xf32> to vector<1x128xf32>
    %c0_30 = arith.constant 0 : index
    %c0_31 = arith.constant 0 : index
    %47 = vector.load %arg11[%c0_30, %c0_31] : memref<32x128xf32, #tpu.memory_space<vmem>>, vector<32x128xf32>
    %48 = arith.subf %47, %1 : vector<32x128xf32>
    %49 = math.absf %48 : vector<32x128xf32>
    %cst_32 = arith.constant dense<0.000000e+00> : vector<128xf32>
    %50 = vector.multi_reduction <add>, %49, %cst_32 [0] : vector<32x128xf32> to vector<128xf32>
    %51 = vector.shape_cast %50 : vector<128xf32> to vector<1x128xf32>
    %52 = arith.addf %46, %51 : vector<1x128xf32>
    %53 = arith.addf %2, %3 : vector<32x128xf32>
    %cst_33 = arith.constant 2.000000e+00 : f32
    %54 = vector.broadcast %cst_33 : f32 to vector<32x128xf32>
    %55 = arith.mulf %54, %1 : vector<32x128xf32>
    %56 = arith.subf %53, %55 : vector<32x128xf32>
    %57 = math.absf %56 : vector<32x128xf32>
    %cst_34 = arith.constant dense<0.000000e+00> : vector<128xf32>
    %58 = vector.multi_reduction <add>, %57, %cst_34 [0] : vector<32x128xf32> to vector<128xf32>
    %59 = vector.shape_cast %58 : vector<128xf32> to vector<1x128xf32>
    %60 = arith.subf %2, %1 : vector<32x128xf32>
    %61 = math.absf %60 : vector<32x128xf32>
    %62 = arith.subf %3, %1 : vector<32x128xf32>
    %63 = math.absf %62 : vector<32x128xf32>
    %64 = arith.addf %61, %63 : vector<32x128xf32>
    %cst_35 = arith.constant dense<0.000000e+00> : vector<128xf32>
    %65 = vector.multi_reduction <add>, %64, %cst_35 [0] : vector<32x128xf32> to vector<128xf32>
    %66 = vector.shape_cast %65 : vector<128xf32> to vector<1x128xf32>
    %67 = tpu.iota {dimensions = array<i32: 0>} : vector<8x128xi32>
    %cst_36 = arith.constant 0.000000e+00 : f32
    %68 = vector.broadcast %cst_36 : f32 to vector<8x128xf32>
    %c0_i32 = arith.constant 0 : i32
    %69 = vector.broadcast %c0_i32 : i32 to vector<8x128xi32>
    %70 = arith.cmpi eq, %67, %69 : vector<8x128xi32>
    %71 = vector.shape_cast %8 : vector<1x128xf32> to vector<1x128xf32>
    %72 = vector.broadcast %71 : vector<1x128xf32> to vector<8x128xf32>
    %73 = arith.select %70, %72, %68 : vector<8x128xi1>, vector<8x128xf32>
    %c1_i32 = arith.constant 1 : i32
    %74 = vector.broadcast %c1_i32 : i32 to vector<8x128xi32>
    %75 = arith.cmpi eq, %67, %74 : vector<8x128xi32>
    %76 = vector.shape_cast %19 : vector<1x128xf32> to vector<1x128xf32>
    %77 = vector.broadcast %76 : vector<1x128xf32> to vector<8x128xf32>
    %78 = arith.select %75, %77, %73 : vector<8x128xi1>, vector<8x128xf32>
    %c2_i32 = arith.constant 2 : i32
    %79 = vector.broadcast %c2_i32 : i32 to vector<8x128xi32>
    %80 = arith.cmpi eq, %67, %79 : vector<8x128xi32>
    %81 = vector.shape_cast %30 : vector<1x128xf32> to vector<1x128xf32>
    %82 = vector.broadcast %81 : vector<1x128xf32> to vector<8x128xf32>
    %83 = arith.select %80, %82, %78 : vector<8x128xi1>, vector<8x128xf32>
    %c3_i32 = arith.constant 3 : i32
    %84 = vector.broadcast %c3_i32 : i32 to vector<8x128xi32>
    %85 = arith.cmpi eq, %67, %84 : vector<8x128xi32>
    %86 = vector.shape_cast %41 : vector<1x128xf32> to vector<1x128xf32>
    %87 = vector.broadcast %86 : vector<1x128xf32> to vector<8x128xf32>
    %88 = arith.select %85, %87, %83 : vector<8x128xi1>, vector<8x128xf32>
    %c4_i32 = arith.constant 4 : i32
    %89 = vector.broadcast %c4_i32 : i32 to vector<8x128xi32>
    %90 = arith.cmpi eq, %67, %89 : vector<8x128xi32>
    %91 = vector.shape_cast %52 : vector<1x128xf32> to vector<1x128xf32>
    %92 = vector.broadcast %91 : vector<1x128xf32> to vector<8x128xf32>
    %93 = arith.select %90, %92, %88 : vector<8x128xi1>, vector<8x128xf32>
    %c5_i32 = arith.constant 5 : i32
    %94 = vector.broadcast %c5_i32 : i32 to vector<8x128xi32>
    %95 = arith.cmpi eq, %67, %94 : vector<8x128xi32>
    %96 = vector.shape_cast %59 : vector<1x128xf32> to vector<1x128xf32>
    %97 = vector.broadcast %96 : vector<1x128xf32> to vector<8x128xf32>
    %98 = arith.select %95, %97, %93 : vector<8x128xi1>, vector<8x128xf32>
    %c6_i32 = arith.constant 6 : i32
    %99 = vector.broadcast %c6_i32 : i32 to vector<8x128xi32>
    %100 = arith.cmpi eq, %67, %99 : vector<8x128xi32>
    %101 = vector.shape_cast %66 : vector<1x128xf32> to vector<1x128xf32>
    %102 = vector.broadcast %101 : vector<1x128xf32> to vector<8x128xf32>
    %103 = arith.select %100, %102, %98 : vector<8x128xi1>, vector<8x128xf32>
    %c0_37 = arith.constant 0 : index
    %c0_38 = arith.constant 0 : index
    %104 = vector.load %arg14[%c0_37, %c0_38] : memref<8x128xf32, #tpu.memory_space<vmem>>, vector<8x128xf32>
    tpu.vector_store %arg14[%c0_37, %c0_38], %103 {strides = array<i32>} : memref<8x128xf32, #tpu.memory_space<vmem>>, vector<8x128xf32>,
    return
  }
  func.func @transform_0(%arg0: i32) -> (i32, i32) {
    %c0_i32 = arith.constant 0 : i32
    %c0_i32_0 = arith.constant 0 : i32
    return %arg0, %c0_i32 : i32, i32
  }
  func.func @transform_1(%arg0: i32) -> (i32, i32) {
    %c0_i32 = arith.constant 0 : i32
    %c0_i32_0 = arith.constant 0 : i32
    return %arg0, %c0_i32 : i32, i32
  }
  func.func @transform_2(%arg0: i32) -> (i32, i32) {
    %c0_i32 = arith.constant 0 : i32
    %c0_i32_0 = arith.constant 0 : i32
    return %arg0, %c0_i32 : i32, i32
  }
  func.func @transform_3(%arg0: i32) -> (i32, i32) {
    %c0_i32 = arith.constant 0 : i32
    %c0_i32_0 = arith.constant 0 : i32
    return %arg0, %c0_i32 : i32, i32
  }
  func.func @transform_4(%arg0: i32) -> (i32, i32) {
    %c0_i32 = arith.constant 0 : i32
    %c0_i32_0 = arith.constant 0 : i32
    return %arg0, %c0_i32 : i32, i32
  }
  func.func @transform_5(%arg0: i32) -> (i32, i32) {
    %c0_i32 = arith.constant 0 : i32
    %c0_i32_0 = arith.constant 0 : i32
    return %arg0, %c0_i32 : i32, i32
  }
  func.func @transform_6(%arg0: i32) -> (i32, i32) {
    %c0_i32 = arith.constant 0 : i32
    %c0_i32_0 = arith.constant 0 : i32
    return %arg0, %c0_i32 : i32, i32
  }
  func.func @transform_7(%arg0: i32) -> (i32, i32) {
    %c0_i32 = arith.constant 0 : i32
    %c0_i32_0 = arith.constant 0 : i32
    return %arg0, %c0_i32 : i32, i32
  }
  func.func @transform_8(%arg0: i32) -> (i32, i32) {
    %c0_i32 = arith.constant 0 : i32
    %c0_i32_0 = arith.constant 0 : i32
    return %arg0, %c0_i32 : i32, i32
  }
  func.func @transform_9(%arg0: i32) -> (i32, i32) {
    %c0_i32 = arith.constant 0 : i32
    %c0_i32_0 = arith.constant 0 : i32
    return %arg0, %c0_i32 : i32, i32
  }
  func.func @transform_10(%arg0: i32) -> (i32, i32) {
    %c0_i32 = arith.constant 0 : i32
    %c0_i32_0 = arith.constant 0 : i32
    return %arg0, %c0_i32 : i32, i32
  }
  func.func @transform_11(%arg0: i32) -> (i32, i32) {
    %c0_i32 = arith.constant 0 : i32
    %c0_i32_0 = arith.constant 0 : i32
    return %arg0, %c0_i32 : i32, i32
  }
  func.func @transform_12(%arg0: i32) -> (i32, i32) {
    %c0_i32 = arith.constant 0 : i32
    %c0_i32_0 = arith.constant 0 : i32
    return %arg0, %c0_i32 : i32, i32
  }
  func.func @transform_13(%arg0: i32) -> (i32, i32) {
    %c0_i32 = arith.constant 0 : i32
    %c0_i32_0 = arith.constant 0 : i32
    return %arg0, %c0_i32 : i32, i32
  }
}

</mosaic_0001>

<bundles_post_ra>
// kernel: tpu_custom_call.1
= control target key start
LH: loop header
LB: loop body
LE: loop exit
PB: predicated region body
PF: predicated region fallthrough
CT: control target
= control target key end

     0   :  { %s2935_s0 = inlined_call_operand.hbm [shape: f32[80,128], index: 0, kind: input, shape index: {}]   ;;  %s2936_s1 = inlined_call_operand.hbm [shape: f32[80,128], index: 1, kind: input, shape index: {}]   ;;  %s2937_s2 = inlined_call_operand.hbm [shape: f32[80,128], index: 2, kind: input, shape index: {}]   ;;  %s2938_s3 = inlined_call_operand.hbm [shape: f32[80,128], index: 3, kind: input, shape index: {}]   ;;  %s2939_s4 = inlined_call_operand.hbm [shape: f32[80,128], index: 4, kind: input, shape index: {}]   ;;  %s2940_s5 = inlined_call_operand.hbm [shape: f32[80,128], index: 5, kind: input, shape index: {}]   ;;  %s2941_s6 = inlined_call_operand.hbm [shape: f32[160,128], index: 6, kind: input, shape index: {}]   ;;  %s2942_s7 = inlined_call_operand.hbm [shape: f32[160,128], index: 7, kind: input, shape index: {}]   ;;  %s2943_s8 = inlined_call_operand.hbm [shape: f32[160,128], index: 8, kind: input, shape index: {}]   ;;  %s2944_s9 = inlined_call_operand.hbm [shape: f32[160,128], index: 9, kind: input, shape index: {}]   ;;  %s2945_s10 = inlined_call_operand.hbm [shape: f32[160,128], index: 10, kind: input, shape index: {}]   ;;  %s2946_s11 = inlined_call_operand.hbm [shape: f32[160,128], index: 11, kind: input, shape index: {}]   ;;  %s2947_s12 = inlined_call_operand.hbm [shape: f32[160,128], index: 12, kind: input, shape index: {}]   ;;  %s2948_s13 = inlined_call_operand.hbm [shape: f32[40,128], index: 13, kind: output, shape index: {}]  }
   0x1   :  { %2966 = sst [smem:[#allocation41_spill]] %s2936_s1 }
   0x2   :  { %2967 = sst [smem:[#allocation42_spill]] %s2938_s3 }
   0x3   :  { %2968 = sst [smem:[#allocation43_spill]] %s2940_s5 }
   0x4   :  { %2969 = sst [smem:[#allocation44_spill]] %s2948_s13 }
   0x5   :  { %18 = vsyncpa [#allocation3], 0 }
   0x6   :  { %20 = vsyncpa [#allocation3 + $0x1], 0 }
   0x7   :  { %21 = vsyncpa [#allocation6], 0 }
   0x8   :  { %23 = vsyncpa [#allocation6 + $0x1], 0 }
   0x9   :  { %24 = vsyncpa [#allocation9], 0 }
   0xa   :  { %26 = vsyncpa [#allocation9 + $0x1], 0 }
   0xb   :  { %27 = vsyncpa [#allocation12], 0 }
   0xc   :  { %29 = vsyncpa [#allocation12 + $0x1], 0 }
   0xd   :  { %30 = vsyncpa [#allocation15], 0 }
   0xe   :  { %32 = vsyncpa [#allocation15 + $0x1], 0 }
   0xf   :  { %33 = vsyncpa [#allocation18], 0 }
  0x10   :  { %35 = vsyncpa [#allocation18 + $0x1], 0 }
  0x11   :  { %36 = vsyncpa [#allocation21], 0 }
  0x12   :  { %38 = vsyncpa [#allocation21 + $0x1], 0 }
  0x13   :  { %39 = vsyncpa [#allocation4], 0 }
  0x14   :  { %41 = vsyncpa [#allocation4 + $0x1], 0  ;;  %s2169_s25 = smov 0   ;;  %s2171_s26 = smov 0  }
  0x15   :  { %s2173_s27 = smov 0   ;;  %s2175_s28 = smov 0  }
  0x16 LB: > { %2970 = sst [smem:[#allocation32_spill]] %s2069_s25  ;;  %s2190_s29 = sadd.s32 4294967295, %s2081_s28   ;;  %s2081_s28 = sphi %s2175_s28, %s3006_s28   ;;  %s2077_s27 = sphi %s2173_s27, %s3009_s27   ;;  %s2073_s26 = sphi %s2171_s26, %s3008_s26   ;;  %s2069_s25 = sphi %s2169_s25, %s3007_s25  }
  0x17   : > { %2971 = sst [smem:[#allocation33_spill]] %s2073_s26  ;;  %s1514_s30 = sadd.s32 4294967294, %s2081_s28  }
  0x18   : > { %2972 = sst [smem:[#allocation34_spill]] %s2077_s27  ;;  %s2194_s14 = sadd.s32 1, %s2081_s28  }
  0x19   : > { %2973 = sst [smem:[#allocation35_spill]] %s2190_s29  ;;  %s54_s15 = sadd.s32 1, %s2077_s27 }
  0x1a   : > { %2974 = sst [smem:[#allocation36_spill]] %s2194_s14  ;;  %s51_s16 = ssub.s32 %s2081_s28, %s2194_s14 }
  0x1b   : > { %p61_p0 = scmp.ne.s32.totalorder %s2077_s27, %s2073_s26  ;;  %p52_p1 = scmp.eq.s32.totalorder %s51_s16, 0 }
  0x1c   : > { %p62_p2 = scmp.eq.s32.totalorder %s2081_s28, 0  ;;  %p67_p3 = scmp.ne.s32.totalorder %s2073_s26, %s2069_s25 }
  0x1d   : > { %p68_p4 = scmp.eq.s32.totalorder %s2190_s29, 0  ;;  %p403_p7 = scmp.eq.s32.totalorder %s2190_s29, 4 }
  0x1e   : > { %s2206_s17 = scalar_select %p52_p1, %s2077_s27, %s54_s15  }
  0x1f   : > { %p2208_p5 = por %p62_p2, %p61_p0  ;;  %p2212_p6 = por %p68_p4, %p67_p3 }
  0x20   : > { %2975 = sst [smem:[#allocation37_spill]] %s2206_s17  ;;  %p409_p8 = scmp.eq.s32.totalorder %s1514_s30, 4 }
  0x21   : > { %s2977_s19 = scalar_select %p2212_p6, 1, 0 }
  0x22   : > { %p2217_p9 = por %p403_p7, %p61_p0  ;;  %p2221_p10 = por %p409_p8, %p67_p3 }
  0x23   : > { %2978 = sst [smem:[#allocation38_spill]] %s2977_s19  ;;  %p1516_p11 = scmp.ge.s32.totalorder %s2081_s28, 5 }
  0x24   : > { %s2979_s20 = scalar_select %p2217_p9, 1, 0 }
  0x25   : > { %s2981_s21 = scalar_select %p2221_p10, 1, 0 }
  0x26   : > { %2980 = sst [smem:[#allocation39_spill]] %s2979_s20  ;;  %425 = sbr.rel (%p1516_p11) target bundleno = 350 (0x15e), region = 16 }
  0x27   : > { %2982 = sst [smem:[#allocation40_spill]] %s2981_s21  ;;  %s2227_s22 = sand.u32 (!%p1516_p11), 1, %s2077_s27  }
  0x28   : > { %s2230_s23 = sshll.u32 (!%p1516_p11), %s2081_s28, 8  ;;  %s2233_s24 = sshll.u32 (!%p1516_p11), %s2227_s22, 4 }
  0x29   : > { %s2236_s30 = sand.u32 (!%p1516_p11), 1, %s2081_s28   ;;  %s2983_s1 = sld [smem:[#allocation41_spill]] (!%p1516_p11) }
  0x2a   : > { %s454_s27 = scalar_lea.vmem (!%p1516_p11), [#allocation5], %s2233_s24 }
  0x2b   : > { %s461_s14 = sshll.u32 %s454_s27, 4  ;;  %s2245_s14 = int_to_ptr.vmem [resolvable:$true] %s461_s14 }
  0x2f   : > { %s2242_s17 = scalar_lea.hbm %s2983_s1, %s2230_s23  ;;  %s1659_s15 = scalar_lea.hbm %s2983_s1, 1280 }
  0x30   : > { %s1655_s25 = scalar_lea.hbm %s2242_s17, 256  ;;  %p1660_p1 = scmp.lt.s32.totalorder %s2242_s17, %s2983_s1 }
  0x31   : > { %p1656_p12 = scmp.ne.s32.totalorder %s2242_s17, %s1655_s25  ;;  %p1661_p2 = scmp.lt.s32.totalorder %s1659_s15, %s1655_s25 }
  0x33   : > { %p1657_p13 = pnand %p1656_p12, %p2208_p5  ;;  %p1662_p3 = por %p1661_p2, %p1660_p1 }
  0x35   : > { %p1658_p0 = pneg %p1657_p13 }
  0x37   : > { %p1663_p4 = pnand %p1662_p3, %p1658_p0 }
  0x39   : > { %1666 = shalt.err (!%p1663_p4)
}
  0x3a   : > { %s1667_s27 = scalar_lea.vmem %s2245_s14, 256  ;;  %s2083_s21 = smov [#allocation5]  }
  0x3b   : > { %p1668_p7 = scmp.ne.s32.totalorder %s2245_s14, %s1667_s27  ;;  %s1671_s13 = sshll.u32 %s2083_s21, 4  ;;  %s1672_s13 = int_to_ptr.vmem [resolvable:$false] %s1671_s13 }
  0x3c   : > { %s1673_s20 = scalar_lea.vmem %s1672_s13, 512  ;;  %p1674_p12 = scmp.lt.s32.totalorder %s2245_s14, %s1672_s13 }
  0x3d   : > { %p1669_p8 = pnand %p1668_p7, %p2208_p5  ;;  %p1675_p13 = scmp.lt.s32.totalorder %s1673_s20, %s1667_s27 }
  0x3f   : > { %p1670_p11 = pneg %p1669_p8  ;;  %p1676_p10 = por %p1675_p13, %p1674_p12 }
  0x41   : > { %p1677_p9 = pnand %p1676_p10, %p1670_p11 }
  0x43   : > { %1680 = shalt.err (!%p1677_p9)
}
  0x44   : > { %s2084_s25 = smov 128   ;;  %s2085_s29 = smov 8  }
  0x45   : > { %s2984_s21 = scalar_lea.sflag [#allocation6], %s2236_s30  ;;  %s2985_s3 = sld [smem:[#allocation42_spill]] }
  0x46   : > { %1589 = dma.hbm_to_vmem [thread:$0]  (%p2208_p5), %s2242_s17, 256, %s2245_s14, %s2984_s21, %s2084_s25, %s2084_s25, %s2085_s29  }
  0x47   : > { %s496_s13 = scalar_lea.vmem [#allocation8], %s2233_s24  ;;  %s2963_s1 = scalar_lea.sflag [#allocation9], %s2236_s30 }
  0x48   : > { %s503_s20 = sshll.u32 %s496_s13, 4  ;;  %s2280_s20 = int_to_ptr.vmem [resolvable:$true] %s503_s20 }
  0x4b   : > { %s2277_s27 = scalar_lea.hbm %s2985_s3, %s2230_s23  ;;  %s1685_s17 = scalar_lea.hbm %s2985_s3, 1280 }
  0x4c   : > { %s1681_s19 = scalar_lea.hbm %s2277_s27, 256  ;;  %p1686_p1 = scmp.lt.s32.totalorder %s2277_s27, %s2985_s3 }
  0x4d   : > { %p1682_p9 = scmp.ne.s32.totalorder %s2277_s27, %s1681_s19  ;;  %p1687_p2 = scmp.lt.s32.totalorder %s1685_s17, %s1681_s19 }
  0x4f   : > { %p1683_p10 = pnand %p1682_p9, %p2208_p5  ;;  %p1688_p3 = por %p1687_p2, %p1686_p1 }
  0x51   : > { %p1684_p0 = pneg %p1683_p10 }
  0x53   : > { %p1689_p4 = pnand %p1688_p3, %p1684_p0 }
  0x55   : > { %1692 = shalt.err (!%p1689_p4)
}
  0x56   : > { %s1693_s16 = scalar_lea.vmem %s2280_s20, 256  ;;  %s2086_s13 = smov [#allocation8]  }
  0x57   : > { %p1694_p7 = scmp.ne.s32.totalorder %s2280_s20, %s1693_s16  ;;  %s1697_s26 = sshll.u32 %s2086_s13, 4  ;;  %s1698_s26 = int_to_ptr.vmem [resolvable:$false] %s1697_s26 }
  0x58   : > { %s1699_s14 = scalar_lea.vmem %s1698_s26, 512  ;;  %p1700_p12 = scmp.lt.s32.totalorder %s2280_s20, %s1698_s26 }
  0x59   : > { %p1695_p8 = pnand %p1694_p7, %p2208_p5  ;;  %p1701_p13 = scmp.lt.s32.totalorder %s1699_s14, %s1693_s16 }
  0x5b   : > { %p1696_p11 = pneg %p1695_p8  ;;  %p1702_p9 = por %p1701_p13, %p1700_p12 }
  0x5d   : > { %p1703_p10 = pnand %p1702_p9, %p1696_p11 }
  0x5f   : > { %1706 = shalt.err (!%p1703_p10)
}
  0x60   : > { %1591 = dma.hbm_to_vmem [thread:$0]  (%p2208_p5), %s2277_s27, 256, %s2280_s20, %s2963_s1, %s2084_s25, %s2084_s25, %s2085_s29  }
  0x61   : > { %s2986_s5 = sld [smem:[#allocation43_spill]]  ;;  %s538_s15 = scalar_lea.vmem [#allocation11], %s2233_s24 }
  0x62   : > { %s545_s16 = sshll.u32 %s538_s15, 4  ;;  %s2318_s13 = sshll.u32 %s2227_s22, 5  ;;  %s2315_s16 = int_to_ptr.vmem [resolvable:$true] %s545_s16 }
  0x67   : > { %s2312_s21 = scalar_lea.hbm %s2986_s5, %s2230_s23  ;;  %s1711_s19 = scalar_lea.hbm %s2986_s5, 1280 }
  0x68   : > { %s1707_s14 = scalar_lea.hbm %s2312_s21, 256  ;;  %p1712_p3 = scmp.lt.s32.totalorder %s2312_s21, %s2986_s5 }
  0x69   : > { %p1708_p0 = scmp.ne.s32.totalorder %s2312_s21, %s1707_s14  ;;  %p1713_p4 = scmp.lt.s32.totalorder %s1711_s19, %s1707_s14 }
  0x6b   : > { %p1709_p1 = pnand %p1708_p0, %p2208_p5  ;;  %p1714_p7 = por %p1713_p4, %p1712_p3 }
  0x6d   : > { %p1710_p2 = pneg %p1709_p1 }
  0x6f   : > { %p1715_p8 = pnand %p1714_p7, %p1710_p2 }
  0x71   : > { %1718 = shalt.err (!%p1715_p8)
}
  0x72   : > { %s1719_s15 = scalar_lea.vmem %s2315_s16, 256  ;;  %s2087_s26 = smov [#allocation11]  }
  0x73   : > { %p1720_p11 = scmp.ne.s32.totalorder %s2315_s16, %s1719_s15  ;;  %s1723_s27 = sshll.u32 %s2087_s26, 4  ;;  %s1724_s27 = int_to_ptr.vmem [resolvable:$false] %s1723_s27 }
  0x74   : > { %s1725_s20 = scalar_lea.vmem %s1724_s27, 512  ;;  %p1726_p9 = scmp.lt.s32.totalorder %s2315_s16, %s1724_s27 }
  0x75   : > { %p1721_p12 = pnand %p1720_p11, %p2208_p5  ;;  %p1727_p10 = scmp.lt.s32.totalorder %s1725_s20, %s1719_s15 }
  0x77   : > { %p1722_p13 = pneg %p1721_p12  ;;  %p1728_p0 = por %p1727_p10, %p1726_p9 }
  0x79   : > { %p1729_p1 = pnand %p1728_p0, %p1722_p13 }
  0x7b   : > { %1732 = shalt.err (!%p1729_p1)
}
  0x7c   : > { %s2987_s1 = scalar_lea.sflag [#allocation12], %s2236_s30  ;;  %s2347_s26 = sshll.u32 %s2081_s28, 9 }
  0x7d   : > { %1593 = dma.hbm_to_vmem [thread:$0]  (%p2208_p5), %s2312_s21, 256, %s2315_s16, %s2987_s1, %s2084_s25, %s2084_s25, %s2085_s29  }
  0x7e   : > { %s2353_s17 = scalar_lea.hbm %s2942_s7, %s2347_s26  ;;  %s580_s15 = scalar_lea.vmem [#allocation14], %s2318_s13 }
  0x7f   : > { %s587_s27 = sshll.u32 %s580_s15, 4  ;;  %s1733_s3 = scalar_lea.hbm %s2353_s17, 512  ;;  %s2356_s27 = int_to_ptr.vmem [resolvable:$true] %s587_s27 }
  0x80   : > { %p1734_p2 = scmp.ne.s32.totalorder %s2353_s17, %s1733_s3  ;;  %s1737_s1 = scalar_lea.hbm %s2942_s7, 2560 }
  0x81   : > { %p1738_p7 = scmp.lt.s32.totalorder %s2353_s17, %s2942_s7  ;;  %p1739_p8 = scmp.lt.s32.totalorder %s1737_s1, %s1733_s3 }
  0x82   : > { %p1735_p3 = pnand %p1734_p2, %p2208_p5 }
  0x83   : > { %p1740_p11 = por %p1739_p8, %p1738_p7 }
  0x84   : > { %p1736_p4 = pneg %p1735_p3 }
  0x86   : > { %p1741_p12 = pnand %p1740_p11, %p1736_p4 }
  0x88   : > { %1744 = shalt.err (!%p1741_p12)
}
  0x89   : > { %s1745_s15 = scalar_lea.vmem %s2356_s27, 512  ;;  %s2088_s20 = smov [#allocation14]  }
  0x8a   : > { %p1746_p13 = scmp.ne.s32.totalorder %s2356_s27, %s1745_s15  ;;  %s1749_s21 = sshll.u32 %s2088_s20, 4  ;;  %s1750_s21 = int_to_ptr.vmem [resolvable:$false] %s1749_s21 }
  0x8b   : > { %s1751_s16 = scalar_lea.vmem %s1750_s21, 1024  ;;  %p1752_p0 = scmp.lt.s32.totalorder %s2356_s27, %s1750_s21 }
  0x8c   : > { %p1747_p9 = pnand %p1746_p13, %p2208_p5  ;;  %p1753_p1 = scmp.lt.s32.totalorder %s1751_s16, %s1745_s15 }
  0x8e   : > { %p1748_p10 = pneg %p1747_p9  ;;  %p1754_p2 = por %p1753_p1, %p1752_p0 }
  0x90   : > { %p1755_p3 = pnand %p1754_p2, %p1748_p10 }
  0x92   : > { %1758 = shalt.err (!%p1755_p3)
}
  0x93   : > { %s2988_s3 = scalar_lea.sflag [#allocation15], %s2236_s30  ;;  %s2388_s14 = scalar_lea.hbm %s2944_s9, %s2347_s26 }
  0x94   : > { %1595 = dma.hbm_to_vmem [thread:$0]  (%p2208_p5), %s2353_s17, 512, %s2356_s27, %s2988_s3, %s2084_s25, %s2084_s25, %s2085_s29  }
  0x95   : > { %s622_s19 = scalar_lea.vmem [#allocation17], %s2318_s13  ;;  %s2964_s21 = scalar_lea.sflag [#allocation18], %s2236_s30 }
  0x96   : > { %s629_s15 = sshll.u32 %s622_s19, 4  ;;  %s1759_s16 = scalar_lea.hbm %s2388_s14, 512  ;;  %s2391_s15 = int_to_ptr.vmem [resolvable:$true] %s629_s15 }
  0x97   : > { %p1760_p4 = scmp.ne.s32.totalorder %s2388_s14, %s1759_s16  ;;  %s1763_s27 = scalar_lea.hbm %s2944_s9, 2560 }
  0x98   : > { %p1764_p11 = scmp.lt.s32.totalorder %s2388_s14, %s2944_s9  ;;  %p1765_p12 = scmp.lt.s32.totalorder %s1763_s27, %s1759_s16 }
  0x99   : > { %p1761_p7 = pnand %p1760_p4, %p2208_p5 }
  0x9a   : > { %p1766_p13 = por %p1765_p12, %p1764_p11 }
  0x9b   : > { %p1762_p8 = pneg %p1761_p7 }
  0x9d   : > { %p1767_p9 = pnand %p1766_p13, %p1762_p8 }
  0x9f   : > { %1770 = shalt.err (!%p1767_p9)
}
  0xa0   : > { %s1771_s1 = scalar_lea.vmem %s2391_s15, 512  ;;  %s2089_s19 = smov [#allocation17]  }
  0xa1   : > { %p1772_p10 = scmp.ne.s32.totalorder %s2391_s15, %s1771_s1  ;;  %s1775_s5 = sshll.u32 %s2089_s19, 4  ;;  %s1776_s5 = int_to_ptr.vmem [resolvable:$false] %s1775_s5 }
  0xa2   : > { %s1777_s17 = scalar_lea.vmem %s1776_s5, 1024  ;;  %p1778_p2 = scmp.lt.s32.totalorder %s2391_s15, %s1776_s5 }
  0xa3   : > { %p1773_p0 = pnand %p1772_p10, %p2208_p5  ;;  %p1779_p3 = scmp.lt.s32.totalorder %s1777_s17, %s1771_s1 }
  0xa5   : > { %p1774_p1 = pneg %p1773_p0  ;;  %p1780_p4 = por %p1779_p3, %p1778_p2 }
  0xa7   : > { %p1781_p7 = pnand %p1780_p4, %p1774_p1 }
  0xa9   : > { %1784 = shalt.err (!%p1781_p7)
}
  0xaa   : > { %1597 = dma.hbm_to_vmem [thread:$0]  (%p2208_p5), %s2388_s14, 512, %s2391_s15, %s2964_s21, %s2084_s25, %s2084_s25, %s2085_s29  }
  0xab   : > { %s2423_s3 = scalar_lea.hbm %s2946_s11, %s2347_s26  ;;  %s664_s20 = scalar_lea.vmem [#allocation20], %s2318_s13 }
  0xac   : > { %s671_s1 = sshll.u32 %s664_s20, 4  ;;  %s2965_s19 = scalar_lea.sflag [#allocation21], %s2236_s30  ;;  %s2426_s1 = int_to_ptr.vmem [resolvable:$true] %s671_s1 }
  0xad   : > { %s1785_s5 = scalar_lea.hbm %s2423_s3, 512  ;;  %s1789_s15 = scalar_lea.hbm %s2946_s11, 2560 }
  0xae   : > { %p1786_p8 = scmp.ne.s32.totalorder %s2423_s3, %s1785_s5  ;;  %p1790_p13 = scmp.lt.s32.totalorder %s2423_s3, %s2946_s11 }
  0xaf   : > { %p1791_p9 = scmp.lt.s32.totalorder %s1789_s15, %s1785_s5 }
  0xb0   : > { %p1787_p11 = pnand %p1786_p8, %p2208_p5 }
  0xb1   : > { %p1792_p10 = por %p1791_p9, %p1790_p13 }
  0xb2   : > { %p1788_p12 = pneg %p1787_p11 }
  0xb4   : > { %p1793_p0 = pnand %p1792_p10, %p1788_p12 }
  0xb6   : > { %1796 = shalt.err (!%p1793_p0)
}
  0xb7   : > { %s1797_s20 = scalar_lea.vmem %s2426_s1, 512  ;;  %s2090_s21 = smov [#allocation20]  }
  0xb8   : > { %p1798_p1 = scmp.ne.s32.totalorder %s2426_s1, %s1797_s20  ;;  %s1801_s17 = sshll.u32 %s2090_s21, 4  ;;  %s1802_s17 = int_to_ptr.vmem [resolvable:$false] %s1801_s17 }
  0xb9   : > { %s1803_s14 = scalar_lea.vmem %s1802_s17, 1024  ;;  %p1804_p4 = scmp.lt.s32.totalorder %s2426_s1, %s1802_s17 }
  0xba   : > { %p1799_p2 = pnand %p1798_p1, %p2208_p5  ;;  %p1805_p7 = scmp.lt.s32.totalorder %s1803_s14, %s1797_s20 }
  0xbc   : > { %p1800_p3 = pneg %p1799_p2  ;;  %p1806_p8 = por %p1805_p7, %p1804_p4 }
  0xbe   : > { %p1807_p11 = pnand %p1806_p8, %p1800_p3 }
  0xc0   : > { %1810 = shalt.err (!%p1807_p11)
}
  0xc1   : > { %1599 = dma.hbm_to_vmem [thread:$0]  (%p2208_p5), %s2423_s3, 512, %s2426_s1, %s2965_s19, %s2084_s25, %s2084_s25, %s2085_s29  }
  0xc2   : > { %s2458_s15 = scalar_lea.hbm %s2935_s0, %s2230_s23  ;;  %s433_s16 = scalar_lea.vmem [#allocation2], %s2233_s24 }
  0xc3   : > { %s440_s27 = sshll.u32 %s433_s16, 4  ;;  %s430_s20 = scalar_lea.sflag [#allocation3], %s2227_s22  ;;  %s2461_s27 = int_to_ptr.vmem [resolvable:$true] %s440_s27 }
  0xc4   : > { %s1811_s17 = scalar_lea.hbm %s2458_s15, 256  ;;  %s1815_s1 = scalar_lea.hbm %s2935_s0, 1280 }
  0xc5   : > { %p1812_p12 = scmp.ne.s32.totalorder %s2458_s15, %s1811_s17  ;;  %p1816_p10 = scmp.lt.s32.totalorder %s2458_s15, %s2935_s0 }
  0xc6   : > { %p1817_p0 = scmp.lt.s32.totalorder %s1815_s1, %s1811_s17 }
  0xc7   : > { %p1813_p13 = pnand %p1812_p12, %p2208_p5 }
  0xc8   : > { %p1818_p1 = por %p1817_p0, %p1816_p10 }
  0xc9   : > { %p1814_p9 = pneg %p1813_p13 }
  0xcb   : > { %p1819_p2 = pnand %p1818_p1, %p1814_p9 }
  0xcd   : > { %1822 = shalt.err (!%p1819_p2)
}
  0xce   : > { %s1823_s22 = scalar_lea.vmem %s2461_s27, 256  ;;  %s2091_s16 = smov [#allocation2]  }
  0xcf   : > { %p1824_p3 = scmp.ne.s32.totalorder %s2461_s27, %s1823_s22  ;;  %s1827_s14 = sshll.u32 %s2091_s16, 4  ;;  %s1828_s14 = int_to_ptr.vmem [resolvable:$false] %s1827_s14 }
  0xd0   : > { %s1829_s3 = scalar_lea.vmem %s1828_s14, 512  ;;  %p1830_p8 = scmp.lt.s32.totalorder %s2461_s27, %s1828_s14 }
  0xd1   : > { %p1825_p4 = pnand %p1824_p3, %p2208_p5  ;;  %p1831_p11 = scmp.lt.s32.totalorder %s1829_s3, %s1823_s22 }
  0xd3   : > { %p1826_p7 = pneg %p1825_p4  ;;  %p1832_p12 = por %p1831_p11, %p1830_p8 }
  0xd5   : > { %p1833_p13 = pnand %p1832_p12, %p1826_p7 }
  0xd7   : > { %1836 = shalt.err (!%p1833_p13)
}
  0xd8   : > { %1588 = dma.hbm_to_vmem [thread:$0]  (%p2208_p5), %s2458_s15, 256, %s2461_s27, %s430_s20, %s2084_s25, %s2084_s25, %s2085_s29  }
  0xd9   : > { %s2491_s21 = scalar_lea.hbm %s2937_s2, %s2230_s23  ;;  %s475_s5 = scalar_lea.vmem [#allocation7], %s2233_s24 }
  0xda   : > { %s482_s22 = sshll.u32 %s475_s5, 4  ;;  %s1837_s16 = scalar_lea.hbm %s2491_s21, 256  ;;  %s483_s22 = int_to_ptr.vmem [resolvable:$true] %s482_s22 }
  0xdb   : > { %p1838_p9 = scmp.ne.s32.totalorder %s2491_s21, %s1837_s16  ;;  %s1841_s15 = scalar_lea.hbm %s2937_s2, 1280 }
  0xdc   : > { %p1842_p1 = scmp.lt.s32.totalorder %s2491_s21, %s2937_s2  ;;  %p1843_p2 = scmp.lt.s32.totalorder %s1841_s15, %s1837_s16 }
  0xdd   : > { %p1839_p10 = pnand %p1838_p9, %p2208_p5 }
  0xde   : > { %p1844_p3 = por %p1843_p2, %p1842_p1 }
  0xdf   : > { %p1840_p0 = pneg %p1839_p10 }
  0xe1   : > { %p1845_p4 = pnand %p1844_p3, %p1840_p0 }
  0xe3   : > { %1848 = shalt.err (!%p1845_p4)
}
  0xe4   : > { %s1849_s17 = scalar_lea.vmem %s483_s22, 256  ;;  %s2092_s1 = smov [#allocation7]  }
  0xe5   : > { %p1850_p7 = scmp.ne.s32.totalorder %s483_s22, %s1849_s17  ;;  %s1853_s5 = sshll.u32 %s2092_s1, 4  ;;  %s1854_s5 = int_to_ptr.vmem [resolvable:$false] %s1853_s5 }
  0xe6   : > { %s1855_s19 = scalar_lea.vmem %s1854_s5, 512  ;;  %p1856_p12 = scmp.lt.s32.totalorder %s483_s22, %s1854_s5 }
  0xe7   : > { %p1851_p8 = pnand %p1850_p7, %p2208_p5  ;;  %p1857_p13 = scmp.lt.s32.totalorder %s1855_s19, %s1849_s17 }
  0xe9   : > { %p1852_p11 = pneg %p1851_p8  ;;  %p1858_p9 = por %p1857_p13, %p1856_p12 }
  0xeb   : > { %p1859_p10 = pnand %p1858_p9, %p1852_p11 }
  0xed   : > { %1862 = shalt.err (!%p1859_p10)
}
  0xee   : > { %s2989_s16 = scalar_lea.sflag [#allocation6], %s2236_s30  ;;  %s2519_s15 = scalar_lea.hbm %s2939_s4, %s2230_s23 }
  0xef   : > { %1590 = dma.hbm_to_vmem [thread:$0]  (%p2208_p5), %s2491_s21, 256, %s483_s22, %s2989_s16, %s2084_s25, %s2084_s25, %s2085_s29  }
  0xf0   : > { %s517_s19 = scalar_lea.vmem [#allocation10], %s2233_s24  ;;  %s1863_s20 = scalar_lea.hbm %s2519_s15, 256 }
  0xf1   : > { %s524_s27 = sshll.u32 %s517_s19, 4  ;;  %p1864_p0 = scmp.ne.s32.totalorder %s2519_s15, %s1863_s20  ;;  %s525_s27 = int_to_ptr.vmem [resolvable:$true] %s524_s27 }
  0xf2   : > { %s1867_s21 = scalar_lea.hbm %s2939_s4, 1280  ;;  %p1868_p3 = scmp.lt.s32.totalorder %s2519_s15, %s2939_s4 }
  0xf3   : > { %p1865_p1 = pnand %p1864_p0, %p2208_p5  ;;  %p1869_p4 = scmp.lt.s32.totalorder %s1867_s21, %s1863_s20 }
  0xf5   : > { %p1866_p2 = pneg %p1865_p1  ;;  %p1870_p7 = por %p1869_p4, %p1868_p3 }
  0xf7   : > { %p1871_p8 = pnand %p1870_p7, %p1866_p2 }
  0xf9   : > { %1874 = shalt.err (!%p1871_p8)
}
  0xfa   : > { %s1875_s23 = scalar_lea.vmem %s525_s27, 256  ;;  %s2093_s24 = smov [#allocation10]  }
  0xfb   : > { %p1876_p11 = scmp.ne.s32.totalorder %s525_s27, %s1875_s23  ;;  %s1879_s16 = sshll.u32 %s2093_s24, 4  ;;  %s1880_s16 = int_to_ptr.vmem [resolvable:$false] %s1879_s16 }
  0xfc   : > { %s1881_s14 = scalar_lea.vmem %s1880_s16, 512  ;;  %p1882_p9 = scmp.lt.s32.totalorder %s525_s27, %s1880_s16 }
  0xfd   : > { %p1877_p12 = pnand %p1876_p11, %p2208_p5  ;;  %p1883_p10 = scmp.lt.s32.totalorder %s1881_s14, %s1875_s23 }
  0xff   : > { %p1878_p13 = pneg %p1877_p12  ;;  %p1884_p0 = por %p1883_p10, %p1882_p9 }
 0x101   : > { %p1885_p1 = pnand %p1884_p0, %p1878_p13 }
 0x103   : > { %1888 = shalt.err (!%p1885_p1)
}
 0x104   : > { %s2990_s3 = scalar_lea.sflag [#allocation9], %s2236_s30  ;;  %s2547_s17 = scalar_lea.hbm %s2941_s6, %s2347_s26 }
 0x105   : > { %1592 = dma.hbm_to_vmem [thread:$0]  (%p2208_p5), %s2519_s15, 256, %s525_s27, %s2990_s3, %s2084_s25, %s2084_s25, %s2085_s29  }
 0x106   : > { %s559_s1 = scalar_lea.vmem [#allocation13], %s2318_s13  ;;  %s1889_s22 = scalar_lea.hbm %s2547_s17, 512 }
 0x107   : > { %s566_s21 = sshll.u32 %s559_s1, 4  ;;  %p1890_p2 = scmp.ne.s32.totalorder %s2547_s17, %s1889_s22  ;;  %s567_s21 = int_to_ptr.vmem [resolvable:$true] %s566_s21 }
 0x108   : > { %s1893_s15 = scalar_lea.hbm %s2941_s6, 2560  ;;  %p1894_p7 = scmp.lt.s32.totalorder %s2547_s17, %s2941_s6 }
 0x109   : > { %p1891_p3 = pnand %p1890_p2, %p2208_p5  ;;  %p1895_p8 = scmp.lt.s32.totalorder %s1893_s15, %s1889_s22 }
 0x10b   : > { %p1892_p4 = pneg %p1891_p3  ;;  %p1896_p11 = por %p1895_p8, %p1894_p7 }
 0x10d   : > { %p1897_p12 = pnand %p1896_p11, %p1892_p4 }
 0x10f   : > { %1900 = shalt.err (!%p1897_p12)
}
 0x110   : > { %s1901_s16 = scalar_lea.vmem %s567_s21, 512  ;;  %s2094_s14 = smov [#allocation13]  }
 0x111   : > { %p1902_p13 = scmp.ne.s32.totalorder %s567_s21, %s1901_s16  ;;  %s1905_s3 = sshll.u32 %s2094_s14, 4  ;;  %s1906_s3 = int_to_ptr.vmem [resolvable:$false] %s1905_s3 }
 0x112   : > { %s1907_s19 = scalar_lea.vmem %s1906_s3, 1024  ;;  %p1908_p0 = scmp.lt.s32.totalorder %s567_s21, %s1906_s3 }
 0x113   : > { %p1903_p9 = pnand %p1902_p13, %p2208_p5  ;;  %p1909_p1 = scmp.lt.s32.totalorder %s1907_s19, %s1901_s16 }
 0x115   : > { %p1904_p10 = pneg %p1903_p9  ;;  %p1910_p2 = por %p1909_p1, %p1908_p0 }
 0x117   : > { %p1911_p3 = pnand %p1910_p2, %p1904_p10 }
 0x119   : > { %1914 = shalt.err (!%p1911_p3)
}
 0x11a   : > { %s2991_s20 = scalar_lea.sflag [#allocation12], %s2236_s30  ;;  %s2575_s5 = scalar_lea.hbm %s2943_s8, %s2347_s26 }
 0x11b   : > { %1594 = dma.hbm_to_vmem [thread:$0]  (%p2208_p5), %s2547_s17, 512, %s567_s21, %s2991_s20, %s2084_s25, %s2084_s25, %s2085_s29  }
 0x11c   : > { %s601_s23 = scalar_lea.vmem [#allocation16], %s2318_s13  ;;  %s1915_s27 = scalar_lea.hbm %s2575_s5, 512 }
 0x11d   : > { %s608_s15 = sshll.u32 %s601_s23, 4  ;;  %p1916_p4 = scmp.ne.s32.totalorder %s2575_s5, %s1915_s27  ;;  %s609_s15 = int_to_ptr.vmem [resolvable:$true] %s608_s15 }
 0x11e   : > { %s1919_s17 = scalar_lea.hbm %s2943_s8, 2560  ;;  %p1920_p11 = scmp.lt.s32.totalorder %s2575_s5, %s2943_s8 }
 0x11f   : > { %p1917_p7 = pnand %p1916_p4, %p2208_p5  ;;  %p1921_p12 = scmp.lt.s32.totalorder %s1919_s17, %s1915_s27 }
 0x121   : > { %p1918_p8 = pneg %p1917_p7  ;;  %p1922_p13 = por %p1921_p12, %p1920_p11 }
 0x123   : > { %p1923_p9 = pnand %p1922_p13, %p1918_p8 }
 0x125   : > { %1926 = shalt.err (!%p1923_p9)
}
 0x126   : > { %s1927_s3 = scalar_lea.vmem %s609_s15, 512  ;;  %s2095_s19 = smov [#allocation16]  }
 0x127   : > { %p1928_p10 = scmp.ne.s32.totalorder %s609_s15, %s1927_s3  ;;  %s1931_s20 = sshll.u32 %s2095_s19, 4  ;;  %s1932_s20 = int_to_ptr.vmem [resolvable:$false] %s1931_s20 }
 0x128   : > { %s1933_s1 = scalar_lea.vmem %s1932_s20, 1024  ;;  %p1934_p2 = scmp.lt.s32.totalorder %s609_s15, %s1932_s20 }
 0x129   : > { %p1929_p0 = pnand %p1928_p10, %p2208_p5  ;;  %p1935_p3 = scmp.lt.s32.totalorder %s1933_s1, %s1927_s3 }
 0x12b   : > { %p1930_p1 = pneg %p1929_p0  ;;  %p1936_p4 = por %p1935_p3, %p1934_p2 }
 0x12d   : > { %p1937_p7 = pnand %p1936_p4, %p1930_p1 }
 0x12f   : > { %1940 = shalt.err (!%p1937_p7)
}
 0x130   : > { %s2992_s22 = scalar_lea.sflag [#allocation15], %s2236_s30  ;;  %s2603_s24 = scalar_lea.hbm %s2945_s10, %s2347_s26 }
 0x131   : > { %1596 = dma.hbm_to_vmem [thread:$0]  (%p2208_p5), %s2575_s5, 512, %s609_s15, %s2992_s22, %s2084_s25, %s2084_s25, %s2085_s29  }
 0x132   : > { %s643_s16 = scalar_lea.vmem [#allocation19], %s2318_s13  ;;  %s1941_s21 = scalar_lea.hbm %s2603_s24, 512 }
 0x133   : > { %s650_s17 = sshll.u32 %s643_s16, 4  ;;  %p1942_p8 = scmp.ne.s32.totalorder %s2603_s24, %s1941_s21  ;;  %s651_s17 = int_to_ptr.vmem [resolvable:$true] %s650_s17 }
 0x134   : > { %s1945_s5 = scalar_lea.hbm %s2945_s10, 2560  ;;  %p1946_p13 = scmp.lt.s32.totalorder %s2603_s24, %s2945_s10 }
 0x135   : > { %p1943_p11 = pnand %p1942_p8, %p2208_p5  ;;  %p1947_p9 = scmp.lt.s32.totalorder %s1945_s5, %s1941_s21 }
 0x137   : > { %p1944_p12 = pneg %p1943_p11  ;;  %p1948_p10 = por %p1947_p9, %p1946_p13 }
 0x139   : > { %p1949_p0 = pnand %p1948_p10, %p1944_p12 }
 0x13b   : > { %1952 = shalt.err (!%p1949_p0)
}
 0x13c   : > { %s1953_s20 = scalar_lea.vmem %s651_s17, 512  ;;  %s2096_s1 = smov [#allocation19]  }
 0x13d   : > { %p1954_p1 = scmp.ne.s32.totalorder %s651_s17, %s1953_s20  ;;  %s1957_s22 = sshll.u32 %s2096_s1, 4  ;;  %s1958_s22 = int_to_ptr.vmem [resolvable:$false] %s1957_s22 }
 0x13e   : > { %s1959_s23 = scalar_lea.vmem %s1958_s22, 1024  ;;  %p1960_p4 = scmp.lt.s32.totalorder %s651_s17, %s1958_s22 }
 0x13f   : > { %p1955_p2 = pnand %p1954_p1, %p2208_p5  ;;  %p1961_p7 = scmp.lt.s32.totalorder %s1959_s23, %s1953_s20 }
 0x141   : > { %p1956_p3 = pneg %p1955_p2  ;;  %p1962_p8 = por %p1961_p7, %p1960_p4 }
 0x143   : > { %p1963_p11 = pnand %p1962_p8, %p1956_p3 }
 0x145   : > { %1966 = shalt.err (!%p1963_p11)
}
 0x146   : > { %s2993_s27 = scalar_lea.sflag [#allocation18], %s2236_s30  ;;  %s2631_s14 = scalar_lea.hbm %s2947_s12, %s2347_s26 }
 0x147   : > { %1598 = dma.hbm_to_vmem [thread:$0]  (%p2208_p5), %s2603_s24, 512, %s651_s17, %s2993_s27, %s2084_s25, %s2084_s25, %s2085_s29  }
 0x148   : > { %s685_s3 = scalar_lea.vmem [#allocation22], %s2318_s13  ;;  %s1967_s15 = scalar_lea.hbm %s2631_s14, 512 }
 0x149   : > { %s692_s5 = sshll.u32 %s685_s3, 4  ;;  %p1968_p12 = scmp.ne.s32.totalorder %s2631_s14, %s1967_s15  ;;  %s693_s5 = int_to_ptr.vmem [resolvable:$true] %s692_s5 }
 0x14a   : > { %s1971_s24 = scalar_lea.hbm %s2947_s12, 2560  ;;  %p1972_p10 = scmp.lt.s32.totalorder %s2631_s14, %s2947_s12 }
 0x14b   : > { %p1969_p13 = pnand %p1968_p12, %p2208_p5  ;;  %p1973_p0 = scmp.lt.s32.totalorder %s1971_s24, %s1967_s15 }
 0x14d   : > { %p1970_p9 = pneg %p1969_p13  ;;  %p1974_p1 = por %p1973_p0, %p1972_p10 }
 0x14f   : > { %p1975_p2 = pnand %p1974_p1, %p1970_p9 }
 0x151   : > { %1978 = shalt.err (!%p1975_p2)
}
 0x152   : > { %s1979_s13 = scalar_lea.vmem %s693_s5, 512  ;;  %s2097_s26 = smov [#allocation22]  }
 0x153   : > { %p1980_p3 = scmp.ne.s32.totalorder %s693_s5, %s1979_s13  ;;  %s1983_s22 = sshll.u32 %s2097_s26, 4  ;;  %s1984_s22 = int_to_ptr.vmem [resolvable:$false] %s1983_s22 }
 0x154   : > { %s1985_s23 = scalar_lea.vmem %s1984_s22, 1024  ;;  %p1986_p8 = scmp.lt.s32.totalorder %s693_s5, %s1984_s22 }
 0x155   : > { %p1981_p4 = pnand %p1980_p3, %p2208_p5  ;;  %p1987_p11 = scmp.lt.s32.totalorder %s1985_s23, %s1979_s13 }
 0x157   : > { %p1982_p7 = pneg %p1981_p4  ;;  %p1988_p12 = por %p1987_p11, %p1986_p8 }
 0x159   : > { %p1989_p13 = pnand %p1988_p12, %p1982_p7 }
 0x15b   : > { %1992 = shalt.err (!%p1989_p13)
}
 0x15c   : > { %s2994_s27 = scalar_lea.sflag [#allocation21], %s2236_s30 }
 0x15d   : > { %1600 = dma.hbm_to_vmem [thread:$0]  (%p2208_p5), %s2631_s14, 512, %s693_s5, %s2994_s27, %s2084_s25, %s2084_s25, %s2085_s29  }
 0x15e PF: > { %p1556_p9 = scmp.ge.s32.totalorder %s2081_s28, 1  ;;  %p700_p10 = scmp.lt.s32.totalorder %s2081_s28, 6 }
 0x160   : > { %p701_p0 = pnand %p1556_p9, %p700_p10 }
 0x161   : > { %s2995_s16 = sld [smem:[#allocation33_spill]] (!%p701_p0) }
 0x162   : > { %704 = sbr.rel (%p701_p0) target bundleno = 461 (0x1cd), region = 72 }
 0x167   : > { %s2658_s3 = sand.u32 1, %s2995_s16  }
 0x168   : > { %s2661_s18 = sshll.u32 %s2658_s3, 4  ;;  %s707_s15 = scalar_lea.sflag [#allocation3], %s2658_s3 }
 0x169   : > { %s710_s30 = scalar_lea.vmem [#allocation2], %s2661_s18 }
 0x16a   : > { %2036 = dma.done.wait (%p2212_p6), %s707_s15, 256  }
 0x16b   : > { %2038 = vsyncadd (%p2212_p6), %s707_s15, 4294967040  ;;  %s2997_s25 = sld [smem:[#allocation35_spill]]  ;;  %s719_s5 = scalar_lea.vmem [#allocation5], %s2661_s18 }
 0x171   : > { %s2670_s29 = sand.u32 1, %s2997_s25  }
 0x172   : > { %s716_s14 = scalar_lea.sflag [#allocation6], %s2670_s29 }
 0x173   : > { %2040 = dma.done.wait (%p2212_p6), %s716_s14, 512  }
 0x174   : > { %2042 = vsyncadd (%p2212_p6), %s716_s14, 4294966784  ;;  %s728_s19 = scalar_lea.vmem [#allocation7], %s2661_s18  ;;  %s734_s20 = scalar_lea.sflag [#allocation9], %s2670_s29 }
 0x175   : > { %s737_s24 = scalar_lea.vmem [#allocation8], %s2661_s18 }
 0x176   : > { %2044 = dma.done.wait (%p2212_p6), %s734_s20, 512  }
 0x177   : > { %2046 = vsyncadd (%p2212_p6), %s734_s20, 4294966784  ;;  %s752_s1 = scalar_lea.sflag [#allocation12], %s2670_s29  ;;  %s755_s13 = scalar_lea.vmem [#allocation11], %s2661_s18 }
 0x178   : > { %2048 = dma.done.wait (%p2212_p6), %s752_s1, 768  }
 0x179   : > { %2050 = vsyncadd (%p2212_p6), %s752_s1, 4294966528  ;;  %s1563_s26 = sshll.u32 %s2658_s3, 5  ;;  %s770_s23 = scalar_lea.sflag [#allocation15], %s2670_s29 }
 0x17a   : > { %s764_s22 = scalar_lea.vmem [#allocation13], %s1563_s26  ;;  %s2694_s27 = scalar_lea.vmem [#allocation14], %s1563_s26 }
 0x17b   : > { %2052 = dma.done.wait (%p2212_p6), %s770_s23, 1024  }
 0x17c   : > { %2054 = vsyncadd (%p2212_p6), %s770_s23, 4294966272  ;;  %s2700_s16 = scalar_lea.vmem [#allocation16], %s1563_s26  ;;  %s788_s15 = scalar_lea.sflag [#allocation18], %s2670_s29 }
 0x17d   : > { %s2703_s14 = scalar_lea.vmem [#allocation17], %s1563_s26 }
 0x17e   : > { %2056 = dma.done.wait (%p2212_p6), %s788_s15, 1024  }
 0x17f   : > { %2058 = vsyncadd (%p2212_p6), %s788_s15, 4294966272  ;;  %s2709_s20 = scalar_lea.vmem [#allocation19], %s1563_s26  ;;  %s806_s1 = scalar_lea.sflag [#allocation21], %s2670_s29 }
 0x180   : > { %s809_s17 = scalar_lea.vmem [#allocation20], %s1563_s26 }
 0x181   : > { %2060 = dma.done.wait (%p2212_p6), %s806_s1, 1024  }
 0x182   : > { %2062 = vsyncadd (%p2212_p6), %s806_s1, 4294966272  ;;  %v1155_v0 = vlaneseq  ;;  %v934_v1 = vld [vmem:[%s755_s13] sm:$0xff]  ;;  %v935_v3 = vld [vmem:[%s755_s13 + $0x8] sm:$0xff]  ;;  %s2734_s21 = scalar_lea.vmem [#allocation22], %s1563_s26 }
 0x183   : > { %v2716_v2 = vld [vmem:[%s764_s22] sm:$0xff]  ;;  %v2718_v4 = vld [vmem:[%s764_s22 + $0x8] sm:$0xff]  ;;  %v2720_v5 = vld [vmem:[%s764_s22 + $0x10] sm:$0xff] }
 0x184   : > { %v2722_v6 = vld [vmem:[%s764_s22 + $0x18] sm:$0xff]  ;;  %v2724_v7 = vld [vmem:[%s809_s17] sm:$0xff]  ;;  %v2726_v8 = vld [vmem:[%s809_s17 + $0x8] sm:$0xff]  ;;  %v2730_v10 = vshrl.u32 %v1155_v0, 7  ;;  %v2743_v14 = vmul.f32 2.0, %v2716_v2  ;;  %v2746_v15 = vmul.f32 2.0, %v2718_v4 }
 0x185   : > { %v2728_v9 = vld [vmem:[%s809_s17 + $0x10] sm:$0xff]  ;;  %v2732_v11 = vld [vmem:[%s809_s17 + $0x18] sm:$0xff]  ;;  %v2737_v12 = vld [vmem:[%s2734_s21] sm:$0xff]  ;;  %v2749_v16 = vmul.f32 2.0, %v2720_v5  ;;  %v2754_v18 = vmul.f32 2.0, %v2722_v6  ;;  %v1126_v19 = vsub.f32 %v2724_v7, %v2716_v2  ;;  %v1127_v20 = vsub.f32 %v2726_v8, %v2718_v4  ;;  %s3001_s22 = sld [smem:[#allocation44_spill]] }
 0x186   : > { %v2740_v13 = vld [vmem:[%s2734_s21 + $0x8] sm:$0xff]  ;;  %v948_v17 = vld [vmem:[%s710_s30] sm:$0xff]  ;;  %v1128_v21 = vsub.f32 %v2728_v9, %v2720_v5  ;;  %v2770_v26 = vadd.f32 %v2737_v12, %v2724_v7  ;;  %v1129_v28 = vsub.f32 %v2732_v11, %v2722_v6  ;;  %v1134_v35 = vsub.f32 %v2737_v12, %v2716_v2  ;;  %v1018_v58 = vld [vmem:[%s2694_s27 + $0x18] sm:$0xff] }
 0x187   : > { %v949_v22 = vld [vmem:[%s710_s30 + $0x8] sm:$0xff]  ;;  %v950_v23 = vsub.f32 %v948_v17, %v934_v1  ;;  %v961_v24 = vld [vmem:[%s719_s5] sm:$0xff]  ;;  %v2774_v27 = vadd.f32 %v2740_v13, %v2726_v8  ;;  %s2998_s30 = scalar_lea.vmem [#allocation10], %s2661_s18  ;;  %vm1157_vm0 = vcmp.eq.s32.totalorder %v2730_v10, 0  ;;  %vm1159_vm1 = vcmp.eq.s32.totalorder %v2730_v10, 1  ;;  %s1570_s18 = sshll.u32 %s2658_s3, 3 }
 0x188   : > { %v962_v25 = vld [vmem:[%s719_s5 + $0x8] sm:$0xff]  ;;  %v951_v29 = vsub.f32 %v949_v22, %v935_v3  ;;  %v963_v30 = vsub.f32 %v961_v24, %v934_v1  ;;  %v974_v32 = vld [vmem:[%s728_s19] sm:$0xff]  ;;  %s2999_s29 = smov %s2998_s30  ;;  %vm1161_vm2 = vcmp.eq.s32.totalorder %v2730_v10, 2  ;;  %vm1163_vm3 = vcmp.eq.s32.totalorder %v2730_v10, 3  ;;  %s3000_s5 = sld [smem:[#allocation39_spill]] }
 0x189   : > { %v964_v31 = vsub.f32 %v962_v25, %v935_v3  ;;  %v975_v33 = vld [vmem:[%s728_s19 + $0x8] sm:$0xff]  ;;  %v988_v34 = vld [vmem:[%s737_s24] sm:$0xff]  ;;  %v952_v36 = vmul.f32 %v950_v23, %v950_v23  ;;  %v976_v37 = vsub.f32 %v974_v32, %v934_v1  ;;  %vm1165_vm4 = vcmp.eq.s32.totalorder %v2730_v10, 4  ;;  %s1572_s19 = sshll.u32 %s2997_s25, 7  ;;  %s2098_s25 = smov [#allocation23]  }
 0x18a   : > { %v977_v38 = vsub.f32 %v975_v33, %v935_v3  ;;  %v989_v39 = vld [vmem:[%s737_s24 + $0x8] sm:$0xff]  ;;  %v990_v40 = vsub.f32 %v988_v34, %v934_v1  ;;  %v1001_v41 = vld [vmem:[%s2998_s30] sm:$0xff]  ;;  %v953_v43 = vmul.f32 %v951_v29, %v951_v29  ;;  %v965_v44 = vmul.f32 %v963_v30, %v963_v30  ;;  %s920_s24 = scalar_lea.vmem [#allocation23], %s1570_s18  ;;  %s1997_s15 = sshll.u32 %s2098_s25, 4  ;;  %s1998_s15 = int_to_ptr.vmem [resolvable:$false] %s1997_s15 }
 0x18b   : > { %v1002_v42 = vld [vmem:[%s2999_s29 + $0x8] sm:$0xff]  ;;  %v966_v45 = vmul.f32 %v964_v31, %v964_v31  ;;  %v991_v46 = vsub.f32 %v989_v39, %v935_v3  ;;  %v1015_v47 = vld [vmem:[%s2694_s27] sm:$0xff]  ;;  %v978_v49 = vmul.f32 %v976_v37, %v976_v37  ;;  %v1003_v52 = vsub.f32 %v1001_v41, %v934_v1  ;;  %v1017_v57 = vld [vmem:[%s2694_s27 + $0x10] sm:$0xff]  ;;  %s1186_s17 = sshll.u32 %s920_s24, 4  ;;  %s2899_s23 = scalar_lea.hbm %s3001_s22, %s1572_s19  ;;  %s1187_s17 = int_to_ptr.vmem [resolvable:$true] %s1186_s17 }
 0x18c   : > { %v1016_v48 = vld [vmem:[%s2694_s27 + $0x8] sm:$0xff]  ;;  %v979_v50 = vmul.f32 %v977_v38, %v977_v38  ;;  %v992_v51 = vmul.f32 %v990_v40, %v990_v40  ;;  %v954_v53 = vadd.f32 %v953_v43, %v952_v36  ;;  %v1004_v56 = vsub.f32 %v1002_v42, %v935_v3  ;;  %v1036_v32 = vld [vmem:[%s2700_s16] sm:$0xff]  ;;  %v2803_v39 = vld [vmem:[%s2734_s21 + $0x10] sm:$0xff]  ;;  %s1173_s27 = scalar_lea.sflag [#allocation4], %s2658_s3  ;;  %p2000_p3 = scmp.lt.s32.totalorder %s1187_s17, %s1998_s15 }
 0x18d   : > { %v967_v54 = vadd.f32 %v966_v45, %v965_v44  ;;  %v993_v55 = vmul.f32 %v991_v46, %v991_v46  ;;  %v1005_v60 = vmul.f32 %v1003_v52, %v1003_v52  ;;  %v1019_v61 = vsub.f32 %v1015_v47, %v2716_v2  ;;  %v1037_v33 = vld [vmem:[%s2700_s16 + $0x8] sm:$0xff]  ;;  %v1038_v44 = vld [vmem:[%s2700_s16 + $0x10] sm:$0xff]  ;;  %v1039_v47 = vld [vmem:[%s2700_s16 + $0x18] sm:$0xff]  ;;  %s1993_s16 = scalar_lea.vmem %s1187_s17, 128 }
 0x18e   : > { %v980_v59 = vadd.f32 %v979_v50, %v978_v49  ;;  %v1020_v62 = vsub.f32 %v1016_v48, %v2718_v4  ;;  %v955_v63 = vrot.slane %v954_v53, 4  ;;  %v1006_v22 = vmul.f32 %v1004_v56, %v1004_v56  ;;  %p1994_p5 = scmp.ne.s32.totalorder %s1187_s17, %s1993_s16  ;;  %p3002_p6 = scmp.ne.s32.totalorder %s3000_s5, 0 }
 0x18f   : > { %v968_v0 = vrot.slane %v967_v54, 4  ;;  %v994_v17 = vadd.f32 %v993_v55, %v992_v51  ;;  %v1021_v23 = vsub.f32 %v1017_v57, %v2720_v5  ;;  %v1022_v3 = vsub.f32 %v1018_v58, %v2722_v6 }
 0x190   : > { %v981_v1 = vrot.slane %v980_v59, 4  ;;  %v1023_v24 = vand.u32 2147483647, %v1019_v61  ;;  %v956_v25 = vadd.f32 %v955_v63, %v954_v53  ;;  %v1007_v31 = vadd.f32 %v1006_v22, %v1005_v60  ;;  %p1995_p1 = pnand %p1994_p5, %p3002_p6 }
 0x191   : > { %v969_v29 = vadd.f32 %v968_v0, %v967_v54  ;;  %v995_v30 = vrot.slane %v994_v17, 4  ;;  %v1024_v36 = vand.u32 2147483647, %v1020_v62  ;;  %v1025_v37 = vand.u32 2147483647, %v1021_v23  ;;  %v2810_v54 = vld [vmem:[%s2734_s21 + $0x18] sm:$0xff] }
 0x192   : > { %v982_v34 = vadd.f32 %v981_v1, %v980_v59  ;;  %v1026_v38 = vand.u32 2147483647, %v1022_v3  ;;  %v957_v40 = vrot.slane %v956_v25, 2  ;;  %v1008_v43 = vrot.slane %v1007_v31, 4  ;;  %v1058_v1 = vld [vmem:[%s2703_s14] sm:$0xff]  ;;  %v1059_v3 = vld [vmem:[%s2703_s14 + $0x8] sm:$0xff]  ;;  %p1996_p2 = pneg %p1995_p1 }
 0x193   : > { %v970_v41 = vrot.slane %v969_v29, 2  ;;  %v996_v42 = vadd.f32 %v995_v30, %v994_v17  ;;  %v1027_v46 = vadd.f32 %v1024_v36, %v1023_v24  ;;  %v1040_v48 = vsub.f32 %v1036_v32, %v2716_v2  ;;  %v1060_v24 = vld [vmem:[%s2703_s14 + $0x10] sm:$0xff]  ;;  %v1061_v36 = vld [vmem:[%s2703_s14 + $0x18] sm:$0xff]  ;;  %s1999_s14 = scalar_lea.vmem %s1998_s15, 256 }
 0x194   : > { %v983_v45 = vrot.slane %v982_v34, 2  ;;  %v1041_v49 = vsub.f32 %v1037_v33, %v2718_v4  ;;  %v958_v50 = vadd.f32 %v957_v40, %v956_v25  ;;  %v1009_v53 = vadd.f32 %v1008_v43, %v1007_v31  ;;  %v1080_v43 = vld [vmem:[%s2709_s20 + $0x8] sm:$0xff]  ;;  %p2001_p4 = scmp.lt.s32.totalorder %s1999_s14, %s1993_s16 }
 0x195   : > { %v971_v51 = vadd.f32 %v970_v41, %v969_v29  ;;  %v997_v52 = vrot.slane %v996_v42, 2  ;;  %v1028_v56 = vadd.f32 %v1027_v46, %v1025_v37  ;;  %v1042_v57 = vsub.f32 %v1038_v44, %v2720_v5 }
 0x196   : > { %v984_v55 = vadd.f32 %v983_v45, %v982_v34  ;;  %v2815_v58 = vadd.f32 %v2803_v39, %v2728_v9  ;;  %v959_v59 = vrot.slane %v958_v50, 1  ;;  %v1043_v62 = vsub.f32 %v1039_v47, %v2722_v6  ;;  %p2002_p7 = por %p2001_p4, %p2000_p3 }
 0x197   : > { %v972_v60 = vrot.slane %v971_v51, 1  ;;  %v998_v61 = vadd.f32 %v997_v52, %v996_v42  ;;  %v1010_v63 = vrot.slane %v1009_v53, 2  ;;  %v1029_v0 = vadd.f32 %v1028_v56, %v1026_v38 }
 0x198   : > { %v1044_v17 = vand.u32 2147483647, %v1040_v48  ;;  %v1045_v22 = vand.u32 2147483647, %v1041_v49  ;;  %v985_v23 = vrot.slane %v984_v55, 1  ;;  %v1104_v25 = vadd.f32 %v2810_v54, %v2732_v11  ;;  %v1081_v48 = vld [vmem:[%s2709_s20 + $0x10] sm:$0xff]  ;;  %p2003_p8 = pnand %p2002_p7, %p1996_p2 }
 0x199   : > { %v1109_v29 = vsub.f32 %v2770_v26, %v2743_v14  ;;  %v2828_v30 = vand.u32 2147483647, %v1126_v19  ;;  %v2830_v31 = vadd.f32 %v959_v59, %v958_v50  ;;  %v2832_v32 = vadd.f32 %v972_v60, %v971_v51  ;;  %v1079_v26 = vld [vmem:[%s2709_s20] sm:$0xff]  ;;  %v1082_v49 = vld [vmem:[%s2709_s20 + $0x18] sm:$0xff] }
 0x19a   : > { %v1030_v33 = vrot.slane %v1029_v0, 4  ;;  %v1046_v34 = vand.u32 2147483647, %v1042_v57  ;;  %v999_v37 = vrot.slane %v998_v61, 1  ;;  %v1047_v38 = vand.u32 2147483647, %v1043_v62 }
 0x19b   : > { %v1048_v40 = vadd.f32 %v1045_v22, %v1044_v17  ;;  %v1062_v14 = vsub.f32 %v1058_v1, %v2716_v2  ;;  %v2837_v41 = vadd.f32 %v1010_v63, %v1009_v53  ;;  %v1063_v19 = vsub.f32 %v1059_v3, %v2718_v4 }
 0x19c   : > { %v1031_v7 = vadd.f32 %v1030_v33, %v1029_v0  ;;  %v1064_v42 = vsub.f32 %v1060_v24, %v2720_v5  ;;  %v2842_v44 = vadd.f32 %v985_v23, %v984_v55  ;;  %v1065_v46 = vsub.f32 %v1061_v36, %v2722_v6 }
 0x19d   : > { %v1049_v45 = vadd.f32 %v1048_v40, %v1046_v34  ;;  %v1066_v47 = vand.u32 2147483647, %v1062_v14  ;;  %v1067_v51 = vand.u32 2147483647, %v1063_v19  ;;  %v1083_v53 = vsub.f32 %v1079_v26, %v2716_v2 }
 0x19e   : > { %v1032_v50 = vrot.slane %v1031_v7, 2  ;;  %v1068_v52 = vand.u32 2147483647, %v1064_v42  ;;  %v2848_v56 = vadd.f32 %v999_v37, %v998_v61  ;;  %v1069_v59 = vand.u32 2147483647, %v1065_v46 }
 0x19f   : > { %v1050_v57 = vadd.f32 %v1049_v45, %v1047_v38  ;;  %v1084_v60 = vsub.f32 %v1080_v43, %v2718_v4  ;;  %v1070_v55 = vadd.f32 %v1067_v51, %v1066_v47  ;;  %v1085_v63 = vsub.f32 %v1081_v48, %v2720_v5 }
 0x1a0   : > { %v1033_v62 = vadd.f32 %v1032_v50, %v1031_v7  ;;  %v1086_v0 = vsub.f32 %v1082_v49, %v2722_v6  ;;  %v1087_v22 = vand.u32 2147483647, %v1083_v53  ;;  %v1110_v23 = vsub.f32 %v2774_v27, %v2746_v15 }
 0x1a1   : > { %v1051_v17 = vrot.slane %v1050_v57, 4  ;;  %v1088_v1 = vand.u32 2147483647, %v1084_v60  ;;  %v1012_v3 = vrot.slane %v2837_v41, 1  ;;  %v1071_v61 = vadd.f32 %v1070_v55, %v1068_v52 }
 0x1a2   : > { %v1089_v24 = vand.u32 2147483647, %v1085_v63  ;;  %v1090_v33 = vand.u32 2147483647, %v1086_v0  ;;  %v1111_v37 = vsub.f32 %v2815_v58, %v2749_v16  ;;  %v1112_v38 = vsub.f32 %v1104_v25, %v2754_v18 }
 0x1a3   : > { %v1052_v34 = vadd.f32 %v1051_v17, %v1050_v57  ;;  %v1091_v36 = vadd.f32 %v1088_v1, %v1087_v22  ;;  %v1034_v40 = vrot.slane %v1033_v62, 1  ;;  %v1072_v14 = vadd.f32 %v1071_v61, %v1069_v59 }
 0x1a4   : > { %v1113_v26 = vand.u32 2147483647, %v1109_v29  ;;  %v1114_v7 = vand.u32 2147483647, %v1110_v23  ;;  %v1115_v27 = vand.u32 2147483647, %v1111_v37  ;;  %v1135_v29 = vsub.f32 %v2740_v13, %v2718_v4 }
 0x1a5   : > { %v1053_v19 = vrot.slane %v1052_v34, 2  ;;  %v1092_v15 = vadd.f32 %v1091_v36, %v1089_v24  ;;  %v1116_v42 = vand.u32 2147483647, %v1112_v38  ;;  %v1073_v43 = vrot.slane %v1072_v14, 4 }
 0x1a6   : > { %v1117_v45 = vadd.f32 %v1114_v7, %v1113_v26  ;;  %v1131_v46 = vand.u32 2147483647, %v1127_v20  ;;  %v1132_v16 = vand.u32 2147483647, %v1128_v21  ;;  %v1133_v25 = vand.u32 2147483647, %v1129_v28 }
 0x1a7   : > { %v1054_v18 = vadd.f32 %v1053_v19, %v1052_v34  ;;  %v1093_v58 = vadd.f32 %v1092_v15, %v1090_v33  ;;  %v1074_v47 = vadd.f32 %v1073_v43, %v1072_v14  ;;  %v1136_v49 = vsub.f32 %v2803_v39, %v2720_v5 }
 0x1a8   : > { %v1118_v48 = vadd.f32 %v1117_v45, %v1115_v27  ;;  %v1137_v8 = vsub.f32 %v2810_v54, %v2722_v6  ;;  %v1138_v21 = vand.u32 2147483647, %v1134_v35  ;;  %v1139_v50 = vand.u32 2147483647, %v1135_v29 }
 0x1a9   : > { %v1055_v20 = vrot.slane %v1054_v18, 1  ;;  %v1094_v9 = vrot.slane %v1093_v58, 4  ;;  %v1075_v11 = vrot.slane %v1074_v47, 2  ;;  %v1140_v51 = vand.u32 2147483647, %v1136_v49 }
 0x1aa   : > { %v1119_v28 = vadd.f32 %v1118_v48, %v1116_v42  ;;  %v1141_v52 = vand.u32 2147483647, %v1137_v8  ;;  %v1013_v4 = vadd.f32 %v1012_v3, %v2837_v41  ;;  %v1142_v53 = vadd.f32 %v1138_v21, %v2828_v30 }
 0x1ab   : > { %v1095_v13 = vadd.f32 %v1094_v9, %v1093_v58  ;;  %v1143_v5 = vadd.f32 %v1139_v50, %v1131_v46  ;;  %v987_v6 = vadd.f32 %v2842_v44, %v2832_v32  ;;  %v1076_v39 = vadd.f32 %v1075_v11, %v1074_v47 }
 0x1ac   : > { %v1120_v54 = vrot.slane %v1119_v28, 4  ;;  %v1144_v57 = vadd.f32 %v1140_v51, %v1132_v16  ;;  %v1145_v2 = vadd.f32 %v1141_v52, %v1133_v25  ;;  %v1158_v35 = vsel %vm1157_vm0, %v2830_v31, 0.0 }
 0x1ad   : > { %v1096_v59 = vrot.slane %v1095_v13, 2  ;;  %v1146_v12 = vadd.f32 %v1143_v5, %v1142_v53  ;;  %v1035_v60 = vadd.f32 %v1034_v40, %v1033_v62  ;;  %v1056_v55 = vadd.f32 %v1055_v20, %v1054_v18 }
 0x1ae   : > { %v1077_v41 = vrot.slane %v1076_v39, 1  ;;  %v1121_v63 = vadd.f32 %v1120_v54, %v1119_v28  ;;  %v1014_v30 = vadd.f32 %v1013_v4, %v2848_v56  ;;  %v1160_v44 = vsel %vm1159_vm1, %v987_v6, %v1158_v35 }
 0x1af   : > { %v1097_v0 = vadd.f32 %v1096_v59, %v1095_v13  ;;  %v1147_v17 = vadd.f32 %v1146_v12, %v1144_v57  ;;  %v1057_v3 = vadd.f32 %v1056_v55, %v1035_v60  ;;  %vm1167_vm5 = vcmp.eq.s32.totalorder %v2730_v10, 5 }
 0x1b0   : > { %v1122_v32 = vrot.slane %v1121_v63, 2  ;;  %v1078_v22 = vadd.f32 %v1077_v41, %v1076_v39  ;;  %v1162_v24 = vsel %vm1161_vm2, %v1014_v30, %v1160_v44  ;;  %vm1169_vm6 = vcmp.eq.s32.totalorder %v2730_v10, 6 }
 0x1b1   : > { %v1098_v1 = vrot.slane %v1097_v0, 1  ;;  %v1148_v23 = vadd.f32 %v1147_v17, %v1145_v2  ;;  %v1164_v36 = vsel %vm1163_vm3, %v1057_v3, %v1162_v24 }
 0x1b2   : > { %v1123_v31 = vadd.f32 %v1122_v32, %v1121_v63 }
 0x1b3   : > { %v1099_v62 = vadd.f32 %v1098_v1, %v1097_v0  ;;  %v1149_v61 = vrot.slane %v1148_v23, 4 }
 0x1b4   : > { %v1124_v56 = vrot.slane %v1123_v31, 1 }
 0x1b5   : > { %v1100_v33 = vadd.f32 %v1099_v62, %v1078_v22  ;;  %v1150_v34 = vadd.f32 %v1149_v61, %v1148_v23 }
 0x1b6   : > { %v1125_v38 = vadd.f32 %v1124_v56, %v1123_v31 }
 0x1b7   : > { %v1151_v37 = vrot.slane %v1150_v34, 2  ;;  %v1166_v14 = vsel %vm1165_vm4, %v1100_v33, %v1164_v36 }
 0x1b8   : > { %v1168_v7 = vsel %vm1167_vm5, %v1125_v38, %v1166_v14 }
 0x1b9   : > { %v1152_v40 = vadd.f32 %v1151_v37, %v1150_v34 }
 0x1bb   : > { %v1153_v26 = vrot.slane %v1152_v40, 1 }
 0x1bd   : > { %v1154_v19 = vadd.f32 %v1153_v26, %v1152_v40 }
 0x1bf   : > { %v1170_v15 = vsel %vm1169_vm6, %v1154_v19, %v1168_v7 }
 0x1c0   : > { %1171 = vst [vmem:[%s920_s24] sm:$0xff] %v1170_v15 }
 0x1c1   : > { %2006 = shalt.err (!%p2003_p8)
}
 0x1c2   : > { %s2007_s20 = scalar_lea.hbm %s2899_s23, 128  ;;  %s2011_s21 = scalar_lea.hbm %s3001_s22, 640 }
 0x1c3   : > { %p2008_p11 = scmp.ne.s32.totalorder %s2899_s23, %s2007_s20  ;;  %p2012_p9 = scmp.lt.s32.totalorder %s2899_s23, %s3001_s22 }
 0x1c4   : > { %p2013_p10 = scmp.lt.s32.totalorder %s2011_s21, %s2007_s20 }
 0x1c5   : > { %p2009_p12 = pnand %p2008_p11, %p3002_p6 }
 0x1c6   : > { %p2014_p0 = por %p2013_p10, %p2012_p9 }
 0x1c7   : > { %p2010_p13 = pneg %p2009_p12 }
 0x1c9   : > { %p2015_p5 = pnand %p2014_p0, %p2010_p13 }
 0x1cb   : > { %2018 = shalt.err (!%p2015_p5)
}
 0x1cc   : > { %1614 = dma.vmem_to_hbm [thread:$0]  (%p3002_p6), %s1187_s17, 128, %s2899_s23, %s1173_s27  }
 0x1cd PF: > { %s3003_s18 = sld [smem:[#allocation32_spill]]  ;;  %p1620_p1 = scmp.ge.s32.totalorder %s2081_s28, 2 }
 0x1ce   : > { %s3004_s19 = sld [smem:[#allocation40_spill]] }
 0x1d3   : > { %s1198_s24 = sand.u32 1, %s3003_s18  }
 0x1d4   : > { %p3005_p2 = scmp.ne.s32.totalorder %s3004_s19, 0  ;;  %s1199_s13 = scalar_lea.sflag [#allocation4], %s1198_s24 }
 0x1d6   : > { %p1617_p3 = pnand %p1620_p1, %p3005_p2 }
 0x1d8   : > { %p1618_p4 = pneg %p1617_p3 }
 0x1da   : > { %2064 = dma.done.wait (%p1618_p4), %s1199_s13, 128  }
 0x1db   : > { %2066 = vsyncadd (%p1618_p4), %s1199_s13, 4294967168  ;;  %s3006_s28 = sld [smem:[#allocation36_spill]] }
 0x1dc   : > { %s3007_s25 = sld [smem:[#allocation33_spill]] }
 0x1dd   : > { %s3008_s26 = sld [smem:[#allocation34_spill]] }
 0x1de   : > { %s3009_s27 = sld [smem:[#allocation37_spill]] }
 0x1e1   : > { %p44_p7 = scmp.ge.s32.totalorder %s3006_s28, 7  }
 0x1e3   :  { %46 = sbr.rel (!%p44_p7) target bundleno = 22 (0x16), region = 261 }
 0x1e8   :  { %1204 = vsyncpa [#allocation3], 1 }
 0x1e9   :  { %1206 = vsyncpa [#allocation3 + $0x1], 1 }
 0x1ea   :  { %1207 = vsyncpa [#allocation6], 1 }
 0x1eb   :  { %1209 = vsyncpa [#allocation6 + $0x1], 1 }
 0x1ec   :  { %1210 = vsyncpa [#allocation9], 1 }
 0x1ed   :  { %1212 = vsyncpa [#allocation9 + $0x1], 1 }
 0x1ee   :  { %1213 = vsyncpa [#allocation12], 1 }
 0x1ef   :  { %1215 = vsyncpa [#allocation12 + $0x1], 1 }
 0x1f0   :  { %1216 = vsyncpa [#allocation15], 1 }
 0x1f1   :  { %1218 = vsyncpa [#allocation15 + $0x1], 1 }
 0x1f2   :  { %1219 = vsyncpa [#allocation18], 1 }
 0x1f3   :  { %1221 = vsyncpa [#allocation18 + $0x1], 1 }
 0x1f4   :  { %1222 = vsyncpa [#allocation21], 1 }
 0x1f5   :  { %1224 = vsyncpa [#allocation21 + $0x1], 1 }
 0x1f6   :  { %1225 = vsyncpa [#allocation4], 1 }
 0x1f7   :  { %1227 = vsyncpa [#allocation4 + $0x1], 1 }

</bundles_post_ra>
